<compile_context>
chip_gen: v6e
topology: v6e:2x2x1
jax: 0.10.0
libtpu: 0.0.40
codegen_flags: <defaults>
</compile_context>

<pallas_src>
import functools

import jax
import jax.numpy as jnp
from jax import lax
from jax.experimental import pallas as pl
from jax.experimental.pallas import tpu as pltpu

# Large finite sentinel for padded reference points: always beaten by any real
# squared-distance score, but keeps min/first/select arithmetic well defined
# (no inf<=inf ambiguity on all-padded lanes).
_PAD_SCORE = 1.0e30


def _round_up(x, m):
    return ((x + m - 1) // m) * m


def _choose_tile(n_pad, pref):
    """Largest multiple of 128 that divides n_pad (a multiple of 128) and <= pref."""
    t = max(128, (min(pref, n_pad) // 128) * 128)
    while n_pad % t != 0:
        t -= 128
    return t


def _icp_kernel(q_ref, last_ref, out_ref, *, n_points, tq, tk, nk_inner):
    """Point-to-plane ICP loss for one (batch, query-tile) grid step.

    q_ref:    (1, 2, 8, tq)  pre-stacked query tile, lane-dense:
                             half 0: sublanes 0-2 = -2*proj, sublane 6 = 1
                             half 1: sublanes 3-5 =    proj, sublane 7 = -1
    last_ref: (1, nk_inner, 8, tk)  whole last frame for this batch, resident
                             in VMEM: sublanes 0-2 vertex, 3-5 normal,
                             6 = |vl|^2 (PAD sentinel for padded refs), 7 = nl.vl
    out_ref:  (1, 1, 8, 128) per-(batch, query-tile) partial loss, lane-dense.
    """
    qi = pl.program_id(1)

    qa = q_ref[0, 0, :, :]                      # (8, tq) -> score half
    qb = q_ref[0, 1, :, :]                      # (8, tq) -> residual half

    def ref_chunk(kk, carry):
        bscore, bresid = carry
        L = last_ref[0, kk, :, :]               # (8, tk) ref chunk (resident, no DMA)

        # Two K=8 MXU matmuls produce score / resid directly (refs on sublanes,
        # queries on lanes):
        #   score[k,q] = |vl_k|^2 - 2*proj_q.vl_k      (|proj_q|^2 dropped: const in k)
        #   resid[k,q] = nl_k.(proj_q - vl_k)
        score = lax.dot_general(L, qa, (((0,), (0,)), ((), ())),
                                preferred_element_type=jnp.float32)     # (tk, tq)
        resid = lax.dot_general(L, qb, (((0,), (0,)), ((), ())),
                                preferred_element_type=jnp.float32)     # (tk, tq)

        # Sublane-axis reductions (VALU-dominated), lane-dense (1, tq) results.
        tile_min = jnp.min(score, axis=0, keepdims=True)                # (1, tq)
        row = lax.broadcasted_iota(jnp.int32, (tk, tq), 0)
        first = jnp.min(jnp.where(score <= tile_min, row, tk),
                        axis=0, keepdims=True)                          # first-min in chunk
        tile_resid = jnp.sum(jnp.where(row == first, resid, 0.0),
                             axis=0, keepdims=True)                     # (1, tq)

        # Strict '<': earlier chunk wins ties == global first-index nearest
        # neighbour (do NOT relax to '<=').
        better = tile_min < bscore
        return (jnp.where(better, tile_min, bscore),
                jnp.where(better, tile_resid, bresid))

    init = (jnp.full((1, tq), jnp.inf, jnp.float32),
            jnp.zeros((1, tq), jnp.float32))
    bscore, bresid = lax.fori_loop(0, nk_inner, ref_chunk, init,
                                   unroll=nk_inner <= 8)

    absr = jnp.abs(bresid)                                              # (1, tq)
    if n_points % tq != 0:                       # padded query lanes contribute 0
        lane = lax.broadcasted_iota(jnp.int32, (1, tq), 1)
        absr = jnp.where(lane + qi * tq < n_points, absr, 0.0)

    out_ref[...] = jnp.full(out_ref.shape, jnp.sum(absr), dtype=out_ref.dtype)


def npoint_loss_forward(lossalldata_last, lossalldata_now, quat, trans,
                        beta=1.0, prweight=1.0, tq_pref=512, tk_pref=1024):
    """Pallas-backed equivalent of NPointLoss.forward (returns (loss, gtloss))."""
    f32 = jnp.float32
    lossalldata_last = lossalldata_last.astype(f32)
    lossalldata_now = lossalldata_now.astype(f32)
    quat = quat.astype(f32)
    trans = trans.astype(f32)

    B, N, _ = lossalldata_now.shape

    # ---- prloss (tiny elementwise glue, plain JAX) -------------------------
    loss_x = jnp.mean((trans - jnp.clip(trans, -10.0, 10.0)) ** 2)
    loss_q = (jnp.mean((quat[:, :2] - jnp.clip(quat[:, :2], -15.0, 15.0)) ** 2)
              + jnp.mean((quat[:, 2] - jnp.clip(quat[:, 2], -15.0, 15.0)) ** 2))
    prloss = loss_x + loss_q * beta

    # ---- tiling ------------------------------------------------------------
    NQp = _round_up(N, 128)
    NKp = NQp
    tq = _choose_tile(NQp, tq_pref)
    tk = _choose_tile(NKp, tk_pref)
    nq = NQp // tq
    nk_inner = NKp // tk

    vm = lossalldata_now[:, :, :3]
    vl = lossalldata_last[:, :, :3]
    nl = lossalldata_last[:, :, 3:6]

    # Projection hoisted out of the kernel (O(N) einsum; kernel work is O(N^2)).
    proj = jnp.einsum('bij,bnj->bni', quat, vm) + trans[:, None, :]     # (B, N, 3)
    projT = jnp.swapaxes(proj, 1, 2)                                    # (B, 3, N)

    # Pre-stacked lane-dense query halves: (B, 2, 8, NQp)
    #   half 0 (score):    sublanes 0-2 = -2*proj, sublane 6 = 1
    #   half 1 (residual): sublanes 3-5 =    proj, sublane 7 = -1
    qstack = jnp.zeros((B, 2, 8, NQp), f32)
    qstack = qstack.at[:, 0, 0:3, :N].set(-2.0 * projT)
    qstack = qstack.at[:, 0, 6, :].set(1.0)
    qstack = qstack.at[:, 1, 3:6, :N].set(projT)
    qstack = qstack.at[:, 1, 7, :].set(-1.0)

    # Last frame, lane-dense + precomputed per-ref scalars in sublanes 6/7:
    #   0-2 vertex, 3-5 normal, 6 = |vl|^2 (PAD sentinel where padded), 7 = nl.vl
    vlT = jnp.swapaxes(vl, 1, 2)                                        # (B, 3, N)
    nlT = jnp.swapaxes(nl, 1, 2)
    vl_sq = jnp.sum(vlT * vlT, axis=1)                                  # (B, N)
    nl_vl = jnp.sum(vlT * nlT, axis=1)                                  # (B, N)
    lastT = jnp.zeros((B, 8, NKp), f32)
    lastT = lastT.at[:, 0:3, :N].set(vlT)
    lastT = lastT.at[:, 3:6, :N].set(nlT)
    lastT = lastT.at[:, 6, :].set(_PAD_SCORE)    # padded refs can never win the argmin
    lastT = lastT.at[:, 6, :N].set(vl_sq)
    lastT = lastT.at[:, 7, :N].set(nl_vl)
    # Chunked view for the in-kernel ref loop: (B, nk_inner, 8, tk)
    last_blk = jnp.swapaxes(lastT.reshape(B, 8, nk_inner, tk), 1, 2)

    # TODO(synk): for N large enough that 2 * 32*N bytes of resident last-frame
    # no longer fits scoped VMEM (~several hundred k points), fall back to a
    # streamed grid=(B, nq, nk) variant instead of per-batch residency.
    kernel = functools.partial(_icp_kernel, n_points=N, tq=tq, tk=tk,
                               nk_inner=nk_inner)

    partials = pl.pallas_call(
        kernel,
        out_shape=jax.ShapeDtypeStruct((B, nq, 8, 128), f32),
        grid_spec=pltpu.PrefetchScalarGridSpec(
            num_scalar_prefetch=0,
            grid=(B, nq),
            in_specs=[
                pl.BlockSpec((1, 2, 8, tq), lambda b, qi: (b, 0, 0, qi)),
                # Whole last frame for batch b, resident across all query tiles
                # (re-DMA'd only when b changes).
                pl.BlockSpec((1, nk_inner, 8, tk), lambda b, qi: (b, 0, 0, 0)),
            ],
            out_specs=pl.BlockSpec((1, 1, 8, 128), lambda b, qi: (b, qi, 0, 0)),
        ),
        compiler_params=pltpu.CompilerParams(
            dimension_semantics=("parallel", "parallel"),
            # Explicit scoped-VMEM budget: resident last frame (double-buffered)
            # + (tk, tq) f32 temporaries; 48 MiB fits v5e/v6e (128 MiB physical)
            # and v7x (64 MiB physical).
            vmem_limit_bytes=48 * 1024 * 1024),
    )(qstack, last_blk)

    icploss = jnp.sum(partials[:, :, 0, 0])
    loss = jnp.reshape(icploss + prloss * prweight, (1,))   # matches torch.zeros(1)+...
    gtloss = jnp.zeros((), f32)
    return loss, gtloss


def _reference_forward(lossalldata_last, lossalldata_now, quat, trans, beta, prweight):
    """Pure-JAX reference for correctness checking."""
    vm = lossalldata_now[:, :, :3]
    vl = lossalldata_last[:, :, :3]
    nl = lossalldata_last[:, :, 3:]
    proj = jnp.einsum('bij,bnj->bni', quat, vm) + trans[:, None, :]
    d2 = jnp.sum((proj[:, :, None, :] - vl[:, None, :, :]) ** 2, axis=-1)
    # TODO(synk): exact index convention of pointutils.knn is ambiguous in the
    # original; we use "for each projected point, nearest point in last frame".
    idx = jnp.argmin(d2, axis=-1)
    vl_nn = jnp.take_along_axis(vl, idx[..., None], axis=1)
    nl_nn = jnp.take_along_axis(nl, idx[..., None], axis=1)
    icp = jnp.sum(jnp.abs(jnp.sum(nl_nn * (proj - vl_nn), axis=-1)))
    loss_x = jnp.mean((trans - jnp.clip(trans, -10.0, 10.0)) ** 2)
    loss_q = (jnp.mean((quat[:, :2] - jnp.clip(quat[:, :2], -15.0, 15.0)) ** 2)
              + jnp.mean((quat[:, 2] - jnp.clip(quat[:, 2], -15.0, 15.0)) ** 2))
    return icp + (loss_x + loss_q * beta) * prweight


if __name__ == "__main__":
    key = jax.random.PRNGKey(0)
    # N=200 is deliberately NOT a multiple of 128 to exercise both query-side
    # and ref-side padding paths.
    B, N = 2, 200

    # Module "parameters" (sx, sq) are only logged in the original and never
    # enter the returned loss; beta/prweight are the scalar hyperparameters.
    beta = 1.0
    prweight = 1.0

    k1, k2, k3, k4 = jax.random.split(key, 4)
    lossalldata_now = jax.random.normal(k1, (B, N, 6), jnp.float32)   # [:, :, :3]=vertex, [:, :, 3:]=normal
    lossalldata_last = jax.random.normal(k2, (B, N, 6), jnp.float32)
    quat = jax.random.normal(k3, (B, 3, 3), jnp.float32) * 0.1        # rota (rotainput=True)
    trans = jax.random.normal(k4, (B, 3), jnp.float32) * 0.1

    loss, gtloss = npoint_loss_forward(lossalldata_last, lossalldata_now,
                                       quat, trans, beta=beta, prweight=prweight)
    loss = jax.block_until_ready(loss)

    ref = _reference_forward(lossalldata_last, lossalldata_now, quat, trans,
                             beta, prweight)
    assert jnp.allclose(loss[0], ref, rtol=1e-3, atol=1e-3), (loss, ref)

    print("KERNEL_OK")
</pallas_src>

<mosaic_0001>
module attributes {stable_mosaic.version = 11 : i64} {
  func.func @_icp_kernel(%arg0: i32, %arg1: i32, %arg2: memref<1x2x8x256xf32, #tpu.memory_space<vmem>>, %arg3: memref<1x1x8x256xf32, #tpu.memory_space<vmem>>, %arg4: memref<1x1x8x128xf32, #tpu.memory_space<vmem>>) attributes {dimension_semantics = [#tpu.dimension_semantics<parallel>, #tpu.dimension_semantics<parallel>], iteration_bounds = array<i64: 2, 1>, scalar_prefetch = 0 : i64, scratch_operands = 0 : i64, tpu.core_type = #tpu.core_type<tc>, window_params = [{transform_indices = @transform_0, window_bounds = array<i64: 1, 2, 8, 256>}, {transform_indices = @transform_1, window_bounds = array<i64: 1, 1, 8, 256>}, {transform_indices = @transform_2, window_bounds = array<i64: 1, 1, 8, 128>}]} {
    %c0 = arith.constant 0 : index
    %c0_0 = arith.constant 0 : index
    %c0_1 = arith.constant 0 : index
    %c0_2 = arith.constant 0 : index
    %0 = vector.load %arg2[%c0, %c0_0, %c0_1, %c0_2] : memref<1x2x8x256xf32, #tpu.memory_space<vmem>>, vector<1x1x8x256xf32>
    %1 = vector.shape_cast %0 : vector<1x1x8x256xf32> to vector<8x256xf32>
    %c0_3 = arith.constant 0 : index
    %c1 = arith.constant 1 : index
    %c0_4 = arith.constant 0 : index
    %c0_5 = arith.constant 0 : index
    %2 = vector.load %arg2[%c0_3, %c1, %c0_4, %c0_5] : memref<1x2x8x256xf32, #tpu.memory_space<vmem>>, vector<1x1x8x256xf32>
    %3 = vector.shape_cast %2 : vector<1x1x8x256xf32> to vector<8x256xf32>
    %cst = arith.constant 0x7F800000 : f32
    %4 = vector.broadcast %cst : f32 to vector<1x256xf32>
    %cst_6 = arith.constant 0.000000e+00 : f32
    %5 = vector.broadcast %cst_6 : f32 to vector<1x256xf32>
    %c0_i32 = arith.constant 0 : i32
    %c0_7 = arith.constant 0 : index
    %6 = arith.index_cast %c0_i32 : i32 to index
    %c0_8 = arith.constant 0 : index
    %c0_9 = arith.constant 0 : index
    %7 = vector.load %arg3[%c0_7, %6, %c0_8, %c0_9] : memref<1x1x8x256xf32, #tpu.memory_space<vmem>>, vector<1x1x8x256xf32>
    %8 = vector.shape_cast %7 : vector<1x1x8x256xf32> to vector<8x256xf32>
    %cst_10 = arith.constant dense<0.000000e+00> : vector<256x256xf32>
    %9 = tpu.matmul %8, %1, %cst_10 {dimension_numbers = #tpu.dot_dimension_numbers<[0], [0], [1], [1], [0, 1, 1, 1], [], []>} : vector<8x256xf32>, vector<8x256xf32>, vector<256x256xf32> -> vector<256x256xf32>
    %cst_11 = arith.constant dense<0.000000e+00> : vector<256x256xf32>
    %10 = tpu.matmul %8, %3, %cst_11 {dimension_numbers = #tpu.dot_dimension_numbers<[0], [0], [1], [1], [0, 1, 1, 1], [], []>} : vector<8x256xf32>, vector<8x256xf32>, vector<256x256xf32> -> vector<256x256xf32>
    %cst_12 = arith.constant dense<0x7F800000> : vector<256xf32>
    %11 = vector.multi_reduction <minimumf>, %9, %cst_12 [0] : vector<256x256xf32> to vector<256xf32>
    %12 = vector.shape_cast %11 : vector<256xf32> to vector<1x256xf32>
    %13 = tpu.iota {dimensions = array<i32: 0>} : vector<256x256xi32>
    %14 = vector.broadcast %12 : vector<1x256xf32> to vector<256x256xf32>
    %15 = arith.cmpf ole, %9, %14 : vector<256x256xf32>
    %c256_i32 = arith.constant 256 : i32
    %16 = vector.broadcast %c256_i32 : i32 to vector<256x256xi32>
    %17 = arith.select %15, %13, %16 : vector<256x256xi1>, vector<256x256xi32>
    %cst_13 = arith.constant dense<2147483647> : vector<256xi32>
    %18 = vector.multi_reduction <minsi>, %17, %cst_13 [0] : vector<256x256xi32> to vector<256xi32>
    %19 = vector.shape_cast %18 : vector<256xi32> to vector<1x256xi32>
    %20 = vector.broadcast %19 : vector<1x256xi32> to vector<256x256xi32>
    %21 = arith.cmpi eq, %13, %20 : vector<256x256xi32>
    %cst_14 = arith.constant 0.000000e+00 : f32
    %22 = vector.broadcast %cst_14 : f32 to vector<256x256xf32>
    %23 = arith.select %21, %10, %22 : vector<256x256xi1>, vector<256x256xf32>
    %cst_15 = arith.constant dense<0.000000e+00> : vector<256xf32>
    %24 = vector.multi_reduction <add>, %23, %cst_15 [0] : vector<256x256xf32> to vector<256xf32>
    %25 = vector.shape_cast %24 : vector<256xf32> to vector<1x256xf32>
    %26 = arith.cmpf olt, %12, %4 : vector<1x256xf32>
    %27 = arith.select %26, %12, %4 : vector<1x256xi1>, vector<1x256xf32>
    %28 = arith.select %26, %25, %5 : vector<1x256xi1>, vector<1x256xf32>
    %c1_i32 = arith.constant 1 : i32
    %29 = math.absf %28 : vector<1x256xf32>
    %30 = tpu.iota {dimensions = array<i32: 1>} : vector<1x256xi32>
    %c256_i32_16 = arith.constant 256 : i32
    %31 = arith.muli %arg1, %c256_i32_16 : i32
    %32 = vector.broadcast %31 : i32 to vector<1x256xi32>
    %33 = arith.addi %30, %32 : vector<1x256xi32>
    %c200_i32 = arith.constant 200 : i32
    %34 = vector.broadcast %c200_i32 : i32 to vector<1x256xi32>
    %35 = arith.cmpi slt, %33, %34 : vector<1x256xi32>
    %cst_17 = arith.constant 0.000000e+00 : f32
    %36 = vector.broadcast %cst_17 : f32 to vector<1x256xf32>
    %37 = arith.select %35, %29, %36 : vector<1x256xi1>, vector<1x256xf32>
    %38 = vector.shape_cast %37 : vector<1x256xf32> to vector<1x1x256xf32>
    %cst_18 = arith.constant dense<0.000000e+00> : vector<1xf32>
    %39 = vector.multi_reduction <add>, %38, %cst_18 [1, 2] : vector<1x1x256xf32> to vector<1xf32>
    %40 = vector.shape_cast %39 : vector<1xf32> to vector<1x1x1xf32>
    %41 = vector.extract %40[0, 0, 0] : f32 from vector<1x1x1xf32>
    %42 = vector.broadcast %41 : f32 to vector<1x1x8x128xf32>
    %c0_19 = arith.constant 0 : index
    %c0_20 = arith.constant 0 : index
    %c0_21 = arith.constant 0 : index
    %c0_22 = arith.constant 0 : index
    %43 = vector.load %arg4[%c0_19, %c0_20, %c0_21, %c0_22] : memref<1x1x8x128xf32, #tpu.memory_space<vmem>>, vector<1x1x8x128xf32>
    tpu.vector_store %arg4[%c0_19, %c0_20, %c0_21, %c0_22], %42 {strides = array<i32>} : memref<1x1x8x128xf32, #tpu.memory_space<vmem>>, vector<1x1x8x128xf32>,
    return
  }
  func.func @transform_0(%arg0: i32, %arg1: i32) -> (i32, i32, i32, i32) {
    %c0_i32 = arith.constant 0 : i32
    %c0_i32_0 = arith.constant 0 : i32
    %c0_i32_1 = arith.constant 0 : i32
    return %arg0, %c0_i32, %c0_i32_0, %arg1 : i32, i32, i32, i32
  }
  func.func @transform_1(%arg0: i32, %arg1: i32) -> (i32, i32, i32, i32) {
    %c0_i32 = arith.constant 0 : i32
    %c0_i32_0 = arith.constant 0 : i32
    %c0_i32_1 = arith.constant 0 : i32
    %c0_i32_2 = arith.constant 0 : i32
    return %arg0, %c0_i32, %c0_i32_0, %c0_i32_1 : i32, i32, i32, i32
  }
  func.func @transform_2(%arg0: i32, %arg1: i32) -> (i32, i32, i32, i32) {
    %c0_i32 = arith.constant 0 : i32
    %c0_i32_0 = arith.constant 0 : i32
    %c0_i32_1 = arith.constant 0 : i32
    return %arg0, %arg1, %c0_i32, %c0_i32_0 : i32, i32, i32, i32
  }
}

</mosaic_0001>

<bundles_post_ra>
// kernel: tpu_custom_call.1
= control target key start
LH: loop header
LB: loop body
LE: loop exit
PB: predicated region body
PF: predicated region fallthrough
CT: control target
= control target key end

     0   :  { %7 = vsyncpa [#allocation3], 0  ;;  %s3193_s0 = inlined_call_operand.hbm [shape: f32[2,2,8,256], index: 0, kind: input, shape index: {}]   ;;  %s3194_s1 = inlined_call_operand.hbm [shape: f32[2,1,8,256], index: 1, kind: input, shape index: {}]   ;;  %s3195_s2 = inlined_call_operand.hbm [shape: f32[2,1,8,128], index: 2, kind: output, shape index: {}]  }
   0x1   :  { %9 = vsyncpa [#allocation3 + $0x1], 0 }
   0x2   :  { %10 = vsyncpa [#allocation6], 0 }
   0x3   :  { %12 = vsyncpa [#allocation6 + $0x1], 0 }
   0x4   :  { %13 = vsyncpa [#allocation4], 0 }
   0x5   :  { %15 = vsyncpa [#allocation4 + $0x1], 0  ;;  %s1953_s9 = smov 0   ;;  %s1955_s10 = smov 0  }
   0x6   :  { %s1957_s11 = smov 0   ;;  %s1959_s12 = smov 0  }
   0x7   :  { %s1961_s13 = smov 0   ;;  %s1963_s14 = smov 0  }
   0x8 LB: > { %s1632_s15 = sadd.s32 4294967295, %s1930_s14   ;;  %s1633_s16 = sadd.s32 4294967294, %s1930_s14   ;;  %s1930_s14 = sphi %s1963_s14, %s21_s14   ;;  %s1926_s13 = sphi %s1961_s13, %s3450_s13   ;;  %s1922_s12 = sphi %s1959_s12, %s3449_s12   ;;  %s1918_s11 = sphi %s1957_s11, %s3448_s11   ;;  %s1914_s10 = sphi %s1955_s10, %s3447_s10   ;;  %s1910_s9 = sphi %s1953_s9, %s3446_s9  }
   0x9   : > { %s33_s17 = sadd.s32 1, %s1926_s13  ;;  %s42_s18 = sadd.s32 1, %s1918_s11 }
   0xa   : > { %p35_p0 = scmp.ge.s32.totalorder %s33_s17, 2  ;;  %p49_p1 = scmp.ne.s32.totalorder %s1918_s11, %s1914_s10 }
   0xb   : > { %p50_p2 = scmp.eq.s32.totalorder %s1930_s14, 0  ;;  %p55_p3 = scmp.ne.s32.totalorder %s1914_s10, %s1910_s9 }
   0xc   : > { %s3452_s17 = smov (%p35_p0, %s33_s17), 0  ;;  %p56_p5 = scmp.eq.s32.totalorder %s1632_s15, 0 }
   0xd   : > { %p1994_p4 = por %p50_p2, %p49_p1  ;;  %s37_s20 = ssub.s32 %s1926_s13, %s3452_s17 }
   0xe   : > { %p107_p6 = scmp.eq.s32.totalorder %s1632_s15, 1  ;;  %p40_p7 = scmp.eq.s32.totalorder %s37_s20, 0 }
   0xf   : > { %p2000_p8 = por %p56_p5, %p55_p3  ;;  %p113_p10 = scmp.eq.s32.totalorder %s1633_s16, 1 }
  0x10   : > { %p2004_p9 = por %p107_p6, %p49_p1  ;;  %p1737_p13 = scmp.lt.s32.totalorder %s1930_s14, 2 }
  0x11   : > { %s2009_s23 = scalar_select %p40_p7, %s1918_s11, %s42_s18  }
  0x12   : > { %p2011_p11 = por %p113_p10, %p55_p3  ;;  %s2018_s25 = sand.u32 1, %s1918_s11  }
  0x13   : > { %s1636_s26 = sshll.u32 %s2018_s25, 5  ;;  %s1716_s27 = sshll.u32 %s1926_s13, 9 }
  0x14   : > { %s145_s30 = scalar_lea.hbm %s3193_s0, %s1716_s27  ;;  %s137_s3 = scalar_lea.vmem [#allocation2], %s1636_s26 }
  0x15   : > { %s146_s4 = sshll.u32 %s137_s3, 4  ;;  %p2027_p0 = pnand %p1737_p13, %p1994_p4  ;;  %s147_s4 = int_to_ptr.vmem [resolvable:$true] %s146_s4 }
  0x16   : > { %p1642_p1 = scmp.ge.s32.totalorder %s1930_s14, 1  ;;  %s134_s6 = scalar_lea.sflag [#allocation3], %s2018_s25 }
  0x17   : > { %p1792_p2 = pneg %p2027_p0  ;;  %s1803_s7 = scalar_lea.vmem %s147_s4, 512 }
  0x18   : > { %p1804_p3 = scmp.ne.s32.totalorder %s147_s4, %s1803_s7  ;;  %s1932_s8 = smov [#allocation2]  }
  0x19   : > { %s1808_s15 = sshll.u32 %s1932_s8, 4  ;;  %s1809_s15 = int_to_ptr.vmem [resolvable:$false] %s1808_s15 }
  0x1a   : > { %p1806_p5 = pnand %p1804_p3, %p1792_p2  ;;  %s1810_s16 = scalar_lea.vmem %s1809_s15, 1024 }
  0x1b   : > { %p1811_p4 = scmp.lt.s32.totalorder %s147_s4, %s1809_s15  ;;  %p1812_p7 = scmp.lt.s32.totalorder %s1810_s16, %s1803_s7 }
  0x1c   : > { %p1807_p6 = pneg %p1806_p5 }
  0x1d   : > { %p1813_p10 = por %p1812_p7, %p1811_p4 }
  0x1f   : > { %p1814_p13 = pnand %p1813_p10, %p1807_p6 }
  0x21   : > { %1817 = shalt.err (!%p1814_p13)
}
  0x22   : > { %s1933_s18 = smov 256   ;;  %s1934_s19 = smov 16  }
  0x23   : > { %1729 = dma.hbm_to_vmem [thread:$0]  (!%p2027_p0), %s145_s30, 512, %s147_s4, %s134_s6, %s1933_s18, %s1933_s18, %s1934_s19  }
  0x24   : > { %p173_p3 = scmp.lt.s32.totalorder %s1930_s14, 3  ;;  %s1639_s20 = sshll.u32 %s2018_s25, 4 }
  0x25   : > { %s1717_s26 = sshll.u32 %s1926_s13, 8  ;;  %s160_s7 = scalar_lea.vmem [#allocation5], %s1639_s20 }
  0x26   : > { %p2045_p5 = pnand %p1642_p1, %p173_p3  ;;  %s166_s3 = scalar_lea.hbm %s3194_s1, %s1717_s26 }
  0x27   : > { %s168_s8 = sshll.u32 %s160_s7, 4  ;;  %s157_s15 = scalar_lea.sflag [#allocation6], %s2018_s25  ;;  %s169_s8 = int_to_ptr.vmem [resolvable:$true] %s168_s8 }
  0x28   : > { %s1831_s16 = scalar_lea.vmem %s169_s8, 256  ;;  %s1935_s30 = smov [#allocation5]  }
  0x29   : > { %p1832_p6 = scmp.ne.s32.totalorder %s169_s8, %s1831_s16  ;;  %s1836_s4 = sshll.u32 %s1935_s30, 4  ;;  %s1837_s4 = int_to_ptr.vmem [resolvable:$false] %s1836_s4 }
  0x2a   : > { %s1838_s6 = scalar_lea.vmem %s1837_s4, 512  ;;  %p1839_p1 = scmp.lt.s32.totalorder %s169_s8, %s1837_s4 }
  0x2b   : > { %p1834_p4 = pnand %p1832_p6, %p1792_p2  ;;  %p1840_p10 = scmp.lt.s32.totalorder %s1838_s6, %s1831_s16 }
  0x2d   : > { %p1835_p7 = pneg %p1834_p4  ;;  %p1841_p13 = por %p1840_p10, %p1839_p1 }
  0x2f   : > { %p1842_p3 = pnand %p1841_p13, %p1835_p7 }
  0x31   : > { %1845 = shalt.err (!%p1842_p3)
}
  0x32   : > { %1732 = dma.hbm_to_vmem [thread:$0]  (!%p2027_p0), %s166_s3, 256, %s169_s8, %s157_s15  }
  0x33   : > { %177 = sbr.rel (%p2045_p5) target bundleno = 917 (0x395), region = 28 }
  0x38   : > { %s2061_s25 = sand.u32 1, %s1914_s10  }
  0x39   : > { %s1643_s18 = sshll.u32 %s2061_s25, 5  ;;  %s180_s19 = scalar_lea.sflag [#allocation3], %s2061_s25 }
  0x3a   : > { %s183_s20 = scalar_lea.vmem [#allocation2], %s1643_s18 }
  0x3b   : > { %1897 = dma.done.wait (%p2000_p8), %s180_s19, 512  }
  0x3c   : > { %1899 = vsyncadd (%p2000_p8), %s180_s19, 4294966784  ;;  %s1644_s5 = sshll.u32 %s2061_s25, 4  ;;  %s189_s26 = scalar_lea.sflag [#allocation6], %s2061_s25 }
  0x3d   : > { %s192_s27 = scalar_lea.vmem [#allocation5], %s1644_s5 }
  0x3e   : > { %1901 = dma.done.wait (%p2000_p8), %s189_s26, 256  }
  0x3f   : > { %1903 = vsyncadd (%p2000_p8), %s189_s26, 4294967040  ;;  %v1936_v0 = vmov 0.0   ;;  %v224_v1 = vld [vmem:[%s192_s27] sm:$0xff]  ;;  %v220_v2 = vld [vmem:[%s183_s20 + $0x8] sm:$0xff]  ;;  %vm290_vm0 = vcmask 64512   ;;  %s1645_s21 = sshll.u32 %s2061_s25, 3 }
  0x40   : > { %451 = vmatprep.mubr.f32.mxu0 %v1936_v0  ;;  %708 = vmatprep.mubr.f32.mxu1 %v1936_v0  ;;  %v1647_v3 = vld [vmem:[%s183_s20 + $0x18] sm:$0xff]  ;;  %v219_v4 = vld [vmem:[%s183_s20] sm:$0xff]  ;;  %v1646_v5 = vld [vmem:[%s183_s20 + $0x10] sm:$0xff]  ;;  %s217_s28 = scalar_lea.vmem [#allocation7], %s1645_s21  ;;  %s1713_s3 = sshll.u32 %s1922_s12, 7 }
  0x41   : > { %226 = vxpose.xlu0.b32.start.end [1/1] (short) %v224_v1, 128  ;;  %417 = vmatprep.subr.mxu0 %v220_v2  ;;  %v225_v6 = vld [vmem:[%s192_s27 + $0x8] sm:$0xff]  ;;  %s1527_s29 = sshll.u32 %s217_s28, 4  ;;  %s1525_s16 = scalar_lea.hbm %s3195_s2, %s1713_s3  ;;  %s3148_s29 = int_to_ptr.vmem [resolvable:$true] %s1527_s29 }
  0x42   : > { %674 = vmatprep.subr.mxu1 %v1647_v3  ;;  %418 = vmatpush1.msra.mxu0 %v219_v4  ;;  %s1513_s30 = scalar_lea.sflag [#allocation4], %s2061_s25  ;;  %s1846_s4 = scalar_lea.vmem %s3148_s29, 128 }
  0x43   : > { %675 = vmatpush1.msra.mxu1 %v1646_v5  ;;  %p1847_p8 = scmp.ne.s32.totalorder %s3148_s29, %s1846_s4  ;;  %s1937_s6 = smov [#allocation7]  }
  0x44   : > { %s1850_s12 = sshll.u32 %s1937_s6, 4  ;;  %s1851_s12 = int_to_ptr.vmem [resolvable:$false] %s1850_s12 }
  0x45   : > { %p1848_p0 = pnand %p1847_p8, %p2004_p9  ;;  %s1852_s18 = scalar_lea.vmem %s1851_s12, 256 }
  0x46   : > { %p1853_p5 = scmp.lt.s32.totalorder %s3148_s29, %s1851_s12  ;;  %p1854_p6 = scmp.lt.s32.totalorder %s1852_s18, %s1846_s4 }
  0x47   : > { %p1849_p2 = pneg %p1848_p0 }
  0x48   : > { %p1855_p4 = por %p1854_p6, %p1853_p5 }
  0x4a   : > { %p1856_p7 = pnand %p1855_p4, %p1849_p2 }
  0x7e   : > { %258 = vxpose.xlu0.b32.start.end [1/1] (short) %v225_v6, 128 }
  0xbd   : > { %v242_v7 = vpop.trf.xlu0 }
  0xbe   : > { %1648 = vmatmul.mubr.msk.f32.vlgmr.msra.gmra.mxu0 %vm290_vm0, %v242_v7  ;;  %1680 = vmatmul.mubr.msk.f32.vlgmr.msra.gmra.mxu1 %vm290_vm0, %v242_v7 }
  0xbf   : > { %457 = vmatprep.mubr.f32.mxu0 %v1936_v0  ;;  %714 = vmatprep.mubr.f32.mxu1 %v1936_v0 }
  0xc1   : > { %v243_v8 = vpop.trf.xlu0 }
  0xc2   : > { %1649 = vmatmul.mubr.msk.f32.gmra.mxu0 %vm290_vm0, %v243_v8  ;;  %1681 = vmatmul.mubr.msk.f32.gmra.mxu1 %vm290_vm0, %v243_v8 }
  0xc3   : > { %463 = vmatprep.mubr.f32.mxu0 %v1936_v0  ;;  %720 = vmatprep.mubr.f32.mxu1 %v1936_v0 }
  0xc5   : > { %v244_v9 = vpop.trf.xlu0 }
  0xc6   : > { %1650 = vmatmul.mubr.msk.f32.gmra.mxu0 %vm290_vm0, %v244_v9  ;;  %1682 = vmatmul.mubr.msk.f32.gmra.mxu1 %vm290_vm0, %v244_v9 }
  0xc7   : > { %469 = vmatprep.mubr.f32.mxu0 %v1936_v0  ;;  %726 = vmatprep.mubr.f32.mxu1 %v1936_v0 }
  0xc9   : > { %v245_v10 = vpop.trf.xlu0 }
  0xca   : > { %1651 = vmatmul.mubr.msk.f32.gmra.mxu0 %vm290_vm0, %v245_v10  ;;  %1683 = vmatmul.mubr.msk.f32.gmra.mxu1 %vm290_vm0, %v245_v10 }
  0xcb   : > { %475 = vmatprep.mubr.f32.mxu0 %v1936_v0  ;;  %732 = vmatprep.mubr.f32.mxu1 %v1936_v0 }
  0xcd   : > { %v246_v11 = vpop.trf.xlu0 }
  0xce   : > { %1652 = vmatmul.mubr.msk.f32.gmra.mxu0 %vm290_vm0, %v246_v11  ;;  %1684 = vmatmul.mubr.msk.f32.gmra.mxu1 %vm290_vm0, %v246_v11 }
  0xcf   : > { %481 = vmatprep.mubr.f32.mxu0 %v1936_v0  ;;  %738 = vmatprep.mubr.f32.mxu1 %v1936_v0 }
  0xd1   : > { %v247_v12 = vpop.trf.xlu0 }
  0xd2   : > { %1653 = vmatmul.mubr.msk.f32.gmra.mxu0 %vm290_vm0, %v247_v12  ;;  %1685 = vmatmul.mubr.msk.f32.gmra.mxu1 %vm290_vm0, %v247_v12 }
  0xd3   : > { %487 = vmatprep.mubr.f32.mxu0 %v1936_v0  ;;  %744 = vmatprep.mubr.f32.mxu1 %v1936_v0 }
  0xd5   : > { %v248_v13 = vpop.trf.xlu0 }
  0xd6   : > { %1654 = vmatmul.mubr.msk.f32.gmra.mxu0 %vm290_vm0, %v248_v13  ;;  %1686 = vmatmul.mubr.msk.f32.gmra.mxu1 %vm290_vm0, %v248_v13 }
  0xd7   : > { %493 = vmatprep.mubr.f32.mxu0 %v1936_v0  ;;  %750 = vmatprep.mubr.f32.mxu1 %v1936_v0 }
  0xd9   : > { %v249_v14 = vpop.trf.xlu0 }
  0xda   : > { %1655 = vmatmul.mubr.msk.f32.gmra.mxu0 %vm290_vm0, %v249_v14  ;;  %1687 = vmatmul.mubr.msk.f32.gmra.mxu1 %vm290_vm0, %v249_v14 }
  0xdb   : > { %499 = vmatprep.mubr.f32.mxu0 %v1936_v0  ;;  %756 = vmatprep.mubr.f32.mxu1 %v1936_v0 }
  0xdd   : > { %v250_v15 = vpop.trf.xlu0 }
  0xde   : > { %1656 = vmatmul.mubr.msk.f32.gmra.mxu0 %vm290_vm0, %v250_v15  ;;  %1688 = vmatmul.mubr.msk.f32.gmra.mxu1 %vm290_vm0, %v250_v15 }
  0xdf   : > { %505 = vmatprep.mubr.f32.mxu0 %v1936_v0  ;;  %762 = vmatprep.mubr.f32.mxu1 %v1936_v0 }
  0xe1   : > { %v251_v16 = vpop.trf.xlu0 }
  0xe2   : > { %1657 = vmatmul.mubr.msk.f32.gmra.mxu0 %vm290_vm0, %v251_v16  ;;  %1689 = vmatmul.mubr.msk.f32.gmra.mxu1 %vm290_vm0, %v251_v16 }
  0xe3   : > { %511 = vmatprep.mubr.f32.mxu0 %v1936_v0  ;;  %768 = vmatprep.mubr.f32.mxu1 %v1936_v0 }
  0xe5   : > { %v252_v17 = vpop.trf.xlu0 }
  0xe6   : > { %1658 = vmatmul.mubr.msk.f32.gmra.mxu0 %vm290_vm0, %v252_v17  ;;  %1690 = vmatmul.mubr.msk.f32.gmra.mxu1 %vm290_vm0, %v252_v17 }
  0xe7   : > { %517 = vmatprep.mubr.f32.mxu0 %v1936_v0  ;;  %774 = vmatprep.mubr.f32.mxu1 %v1936_v0 }
  0xe9   : > { %v253_v18 = vpop.trf.xlu0 }
  0xea   : > { %1659 = vmatmul.mubr.msk.f32.gmra.mxu0 %vm290_vm0, %v253_v18  ;;  %1691 = vmatmul.mubr.msk.f32.gmra.mxu1 %vm290_vm0, %v253_v18 }
  0xeb   : > { %523 = vmatprep.mubr.f32.mxu0 %v1936_v0  ;;  %780 = vmatprep.mubr.f32.mxu1 %v1936_v0 }
  0xed   : > { %v254_v19 = vpop.trf.xlu0 }
  0xee   : > { %1660 = vmatmul.mubr.msk.f32.gmra.mxu0 %vm290_vm0, %v254_v19  ;;  %1692 = vmatmul.mubr.msk.f32.gmra.mxu1 %vm290_vm0, %v254_v19 }
  0xef   : > { %529 = vmatprep.mubr.f32.mxu0 %v1936_v0  ;;  %786 = vmatprep.mubr.f32.mxu1 %v1936_v0 }
  0xf1   : > { %v255_v20 = vpop.trf.xlu0 }
  0xf2   : > { %1661 = vmatmul.mubr.msk.f32.gmra.mxu0 %vm290_vm0, %v255_v20  ;;  %1693 = vmatmul.mubr.msk.f32.gmra.mxu1 %vm290_vm0, %v255_v20 }
  0xf3   : > { %535 = vmatprep.mubr.f32.mxu0 %v1936_v0  ;;  %792 = vmatprep.mubr.f32.mxu1 %v1936_v0 }
  0xf5   : > { %v256_v21 = vpop.trf.xlu0 }
  0xf6   : > { %1662 = vmatmul.mubr.msk.f32.gmra.mxu0 %vm290_vm0, %v256_v21  ;;  %1694 = vmatmul.mubr.msk.f32.gmra.mxu1 %vm290_vm0, %v256_v21 }
  0xf7   : > { %541 = vmatprep.mubr.f32.mxu0 %v1936_v0  ;;  %798 = vmatprep.mubr.f32.mxu1 %v1936_v0 }
  0xf9   : > { %v257_v22 = vpop.trf.xlu0 }
  0xfa   : > { %1663 = vmatmul.mubr.msk.f32.gmra.mxu0 %vm290_vm0, %v257_v22  ;;  %1695 = vmatmul.mubr.msk.f32.gmra.mxu1 %vm290_vm0, %v257_v22 }
  0xfb   : > { %547 = vmatprep.mubr.f32.mxu0 %v1936_v0  ;;  %804 = vmatprep.mubr.f32.mxu1 %v1936_v0 }
  0xfd   : > { %v274_v23 = vpop.trf.xlu0 }
  0xfe   : > { %1664 = vmatmul.mubr.msk.f32.gmra.mxu0 %vm290_vm0, %v274_v23  ;;  %1696 = vmatmul.mubr.msk.f32.gmra.mxu1 %vm290_vm0, %v274_v23 }
  0xff   : > { %553 = vmatprep.mubr.f32.mxu0 %v1936_v0  ;;  %810 = vmatprep.mubr.f32.mxu1 %v1936_v0 }
 0x101   : > { %v275_v24 = vpop.trf.xlu0 }
 0x102   : > { %1665 = vmatmul.mubr.msk.f32.gmra.mxu0 %vm290_vm0, %v275_v24  ;;  %1697 = vmatmul.mubr.msk.f32.gmra.mxu1 %vm290_vm0, %v275_v24 }
 0x103   : > { %559 = vmatprep.mubr.f32.mxu0 %v1936_v0  ;;  %816 = vmatprep.mubr.f32.mxu1 %v1936_v0 }
 0x105   : > { %v276_v25 = vpop.trf.xlu0 }
 0x106   : > { %1666 = vmatmul.mubr.msk.f32.gmra.mxu0 %vm290_vm0, %v276_v25  ;;  %1698 = vmatmul.mubr.msk.f32.gmra.mxu1 %vm290_vm0, %v276_v25 }
 0x107   : > { %565 = vmatprep.mubr.f32.mxu0 %v1936_v0  ;;  %822 = vmatprep.mubr.f32.mxu1 %v1936_v0 }
 0x109   : > { %v277_v26 = vpop.trf.xlu0 }
 0x10a   : > { %1667 = vmatmul.mubr.msk.f32.gmra.mxu0 %vm290_vm0, %v277_v26  ;;  %1699 = vmatmul.mubr.msk.f32.gmra.mxu1 %vm290_vm0, %v277_v26 }
 0x10b   : > { %571 = vmatprep.mubr.f32.mxu0 %v1936_v0  ;;  %828 = vmatprep.mubr.f32.mxu1 %v1936_v0 }
 0x10d   : > { %v278_v27 = vpop.trf.xlu0 }
 0x10e   : > { %1668 = vmatmul.mubr.msk.f32.gmra.mxu0 %vm290_vm0, %v278_v27  ;;  %1700 = vmatmul.mubr.msk.f32.gmra.mxu1 %vm290_vm0, %v278_v27 }
 0x10f   : > { %577 = vmatprep.mubr.f32.mxu0 %v1936_v0  ;;  %834 = vmatprep.mubr.f32.mxu1 %v1936_v0 }
 0x111   : > { %v279_v28 = vpop.trf.xlu0 }
 0x112   : > { %1669 = vmatmul.mubr.msk.f32.gmra.mxu0 %vm290_vm0, %v279_v28  ;;  %1701 = vmatmul.mubr.msk.f32.gmra.mxu1 %vm290_vm0, %v279_v28 }
 0x113   : > { %583 = vmatprep.mubr.f32.mxu0 %v1936_v0  ;;  %840 = vmatprep.mubr.f32.mxu1 %v1936_v0 }
 0x115   : > { %v280_v29 = vpop.trf.xlu0 }
 0x116   : > { %1670 = vmatmul.mubr.msk.f32.gmra.mxu0 %vm290_vm0, %v280_v29  ;;  %1702 = vmatmul.mubr.msk.f32.gmra.mxu1 %vm290_vm0, %v280_v29 }
 0x117   : > { %589 = vmatprep.mubr.f32.mxu0 %v1936_v0  ;;  %846 = vmatprep.mubr.f32.mxu1 %v1936_v0 }
 0x119   : > { %v281_v30 = vpop.trf.xlu0 }
 0x11a   : > { %1671 = vmatmul.mubr.msk.f32.gmra.mxu0 %vm290_vm0, %v281_v30  ;;  %1703 = vmatmul.mubr.msk.f32.gmra.mxu1 %vm290_vm0, %v281_v30 }
 0x11b   : > { %595 = vmatprep.mubr.f32.mxu0 %v1936_v0  ;;  %852 = vmatprep.mubr.f32.mxu1 %v1936_v0 }
 0x11d   : > { %v282_v31 = vpop.trf.xlu0 }
 0x11e   : > { %1672 = vmatmul.mubr.msk.f32.gmra.mxu0 %vm290_vm0, %v282_v31  ;;  %1704 = vmatmul.mubr.msk.f32.gmra.mxu1 %vm290_vm0, %v282_v31 }
 0x11f   : > { %601 = vmatprep.mubr.f32.mxu0 %v1936_v0  ;;  %858 = vmatprep.mubr.f32.mxu1 %v1936_v0 }
 0x121   : > { %v283_v32 = vpop.trf.xlu0 }
 0x122   : > { %1673 = vmatmul.mubr.msk.f32.gmra.mxu0 %vm290_vm0, %v283_v32  ;;  %1705 = vmatmul.mubr.msk.f32.gmra.mxu1 %vm290_vm0, %v283_v32 }
 0x123   : > { %607 = vmatprep.mubr.f32.mxu0 %v1936_v0  ;;  %864 = vmatprep.mubr.f32.mxu1 %v1936_v0 }
 0x125   : > { %v284_v33 = vpop.trf.xlu0 }
 0x126   : > { %1674 = vmatmul.mubr.msk.f32.gmra.mxu0 %vm290_vm0, %v284_v33  ;;  %1706 = vmatmul.mubr.msk.f32.gmra.mxu1 %vm290_vm0, %v284_v33 }
 0x127   : > { %613 = vmatprep.mubr.f32.mxu0 %v1936_v0  ;;  %870 = vmatprep.mubr.f32.mxu1 %v1936_v0 }
 0x129   : > { %v285_v34 = vpop.trf.xlu0 }
 0x12a   : > { %1675 = vmatmul.mubr.msk.f32.gmra.mxu0 %vm290_vm0, %v285_v34  ;;  %1707 = vmatmul.mubr.msk.f32.gmra.mxu1 %vm290_vm0, %v285_v34 }
 0x12b   : > { %619 = vmatprep.mubr.f32.mxu0 %v1936_v0  ;;  %876 = vmatprep.mubr.f32.mxu1 %v1936_v0 }
 0x12d   : > { %v286_v35 = vpop.trf.xlu0 }
 0x12e   : > { %1676 = vmatmul.mubr.msk.f32.gmra.mxu0 %vm290_vm0, %v286_v35  ;;  %1708 = vmatmul.mubr.msk.f32.gmra.mxu1 %vm290_vm0, %v286_v35 }
 0x12f   : > { %625 = vmatprep.mubr.f32.mxu0 %v1936_v0  ;;  %882 = vmatprep.mubr.f32.mxu1 %v1936_v0 }
 0x131   : > { %v287_v36 = vpop.trf.xlu0 }
 0x132   : > { %1677 = vmatmul.mubr.msk.f32.gmra.mxu0 %vm290_vm0, %v287_v36  ;;  %1709 = vmatmul.mubr.msk.f32.gmra.mxu1 %vm290_vm0, %v287_v36 }
 0x133   : > { %631 = vmatprep.mubr.f32.mxu0 %v1936_v0  ;;  %888 = vmatprep.mubr.f32.mxu1 %v1936_v0 }
 0x135   : > { %v288_v37 = vpop.trf.xlu0 }
 0x136   : > { %1678 = vmatmul.mubr.msk.f32.gmra.mxu0 %vm290_vm0, %v288_v37  ;;  %1710 = vmatmul.mubr.msk.f32.gmra.mxu1 %vm290_vm0, %v288_v37 }
 0x137   : > { %637 = vmatprep.mubr.f32.mxu0 %v1936_v0  ;;  %894 = vmatprep.mubr.f32.mxu1 %v1936_v0 }
 0x139   : > { %v289_v38 = vpop.trf.xlu0 }
 0x13a   : > { %1679 = vmatmul.mubr.msk.f32.gmra.mxu0 %vm290_vm0, %v289_v38  ;;  %1711 = vmatmul.mubr.msk.f32.gmra.mxu1 %vm290_vm0, %v289_v38 }
 0x17e   : > { %v2203_v39 = vpop.f32.mrf.mxu0  ;;  %v2231_v53 = vpop.f32.mrf.mxu1 }
 0x17f   : > { %3275 = vst [vmem:[#allocation18_spill] sm:$0xff] %v2231_v53 }
 0x180   : > { %v2205_v40 = vpop.f32.mrf.mxu0  ;;  %v2237_v56 = vpop.f32.mrf.mxu1 }
 0x181   : > { %3268 = vst [vmem:[#allocation11_spill] sm:$0xff] %v2205_v40  ;;  %3277 = vst [vmem:[#allocation20_spill] sm:$0xff] %v2237_v56 }
 0x182   : > { %v2207_v41 = vpop.f32.mrf.mxu0  ;;  %v2243_v59 = vpop.f32.mrf.mxu1 }
 0x183   : > { %3279 = vst [vmem:[#allocation22_spill] sm:$0xff] %v2243_v59 }
 0x184   : > { %v2209_v42 = vpop.f32.mrf.mxu0  ;;  %v2249_v62 = vpop.f32.mrf.mxu1 }
 0x185   : > { %3269 = vst [vmem:[#allocation12_spill] sm:$0xff] %v2209_v42  ;;  %3281 = vst [vmem:[#allocation24_spill] sm:$0xff] %v2249_v62 }
 0x186   : > { %v2211_v43 = vpop.f32.mrf.mxu0  ;;  %v2255_v1 = vpop.f32.mrf.mxu1 }
 0x187   : > { %3283 = vst [vmem:[#allocation26_spill] sm:$0xff] %v2255_v1 }
 0x188   : > { %v2213_v44 = vpop.f32.mrf.mxu0  ;;  %v2261_v4 = vpop.f32.mrf.mxu1 }
 0x189   : > { %3270 = vst [vmem:[#allocation13_spill] sm:$0xff] %v2213_v44  ;;  %3285 = vst [vmem:[#allocation28_spill] sm:$0xff] %v2261_v4 }
 0x18a   : > { %v2215_v45 = vpop.f32.mrf.mxu0  ;;  %v2267_v7 = vpop.f32.mrf.mxu1 }
 0x18b   : > { %3287 = vst [vmem:[#allocation30_spill] sm:$0xff] %v2267_v7 }
 0x18c   : > { %v2217_v46 = vpop.f32.mrf.mxu0  ;;  %v2273_v10 = vpop.f32.mrf.mxu1 }
 0x18d   : > { %3271 = vst [vmem:[#allocation14_spill] sm:$0xff] %v2217_v46  ;;  %3289 = vst [vmem:[#allocation32_spill] sm:$0xff] %v2273_v10  ;;  %v901_v10 = vmin.f32 %v2203_v39, %v2211_v43 }
 0x18e   : > { %v2219_v47 = vpop.f32.mrf.mxu0  ;;  %v2279_v13 = vpop.f32.mrf.mxu1 }
 0x18f   : > { %3291 = vst [vmem:[#allocation34_spill] sm:$0xff] %v2279_v13  ;;  %v903_v62 = vmin.f32 %v901_v10, %v2219_v47  ;;  %v939_v10 = vmin.f32 %v2209_v42, %v2217_v46 }
 0x190   : > { %v2221_v48 = vpop.f32.mrf.mxu0  ;;  %v2285_v16 = vpop.f32.mrf.mxu1 }
 0x191   : > { %3272 = vst [vmem:[#allocation15_spill] sm:$0xff] %v2221_v48  ;;  %3293 = vst [vmem:[#allocation36_spill] sm:$0xff] %v2285_v16 }
 0x192   : > { %v2223_v49 = vpop.f32.mrf.mxu0  ;;  %v2291_v19 = vpop.f32.mrf.mxu1 }
 0x193   : > { %3295 = vst [vmem:[#allocation38_spill] sm:$0xff] %v2291_v19 }
 0x194   : > { %v2225_v50 = vpop.f32.mrf.mxu0  ;;  %v2297_v22 = vpop.f32.mrf.mxu1 }
 0x195   : > { %3273 = vst [vmem:[#allocation16_spill] sm:$0xff] %v2225_v50  ;;  %3297 = vst [vmem:[#allocation40_spill] sm:$0xff] %v2297_v22 }
 0x196   : > { %v2227_v51 = vpop.f32.mrf.mxu0  ;;  %v2303_v25 = vpop.f32.mrf.mxu1 }
 0x197   : > { %3299 = vst [vmem:[#allocation42_spill] sm:$0xff] %v2303_v25 }
 0x198   : > { %v2229_v52 = vpop.f32.mrf.mxu0  ;;  %v2309_v28 = vpop.f32.mrf.mxu1 }
 0x199   : > { %3274 = vst [vmem:[#allocation17_spill] sm:$0xff] %v2229_v52  ;;  %3301 = vst [vmem:[#allocation44_spill] sm:$0xff] %v2309_v28 }
 0x19a   : > { %v2233_v54 = vpop.f32.mrf.mxu0  ;;  %v2315_v31 = vpop.f32.mrf.mxu1 }
 0x19b   : > { %3303 = vst [vmem:[#allocation46_spill] sm:$0xff] %v2315_v31 }
 0x19c   : > { %v2235_v55 = vpop.f32.mrf.mxu0  ;;  %v2321_v34 = vpop.f32.mrf.mxu1 }
 0x19d   : > { %3276 = vst [vmem:[#allocation19_spill] sm:$0xff] %v2235_v55  ;;  %3305 = vst [vmem:[#allocation48_spill] sm:$0xff] %v2321_v34  ;;  %v902_v34 = vmin.f32 %v2207_v41, %v2215_v45 }
 0x19e   : > { %v2239_v57 = vpop.f32.mrf.mxu0  ;;  %v2327_v37 = vpop.f32.mrf.mxu1 }
 0x19f   : > { %3307 = vst [vmem:[#allocation50_spill] sm:$0xff] %v2327_v37  ;;  %v904_v56 = vmin.f32 %v902_v34, %v2223_v49 }
 0x1a0   : > { %v2241_v58 = vpop.f32.mrf.mxu0  ;;  %v2333_v22 = vpop.f32.mrf.mxu1 }
 0x1a1   : > { %3278 = vst [vmem:[#allocation21_spill] sm:$0xff] %v2241_v58  ;;  %3309 = vst [vmem:[#allocation52_spill] sm:$0xff] %v2333_v22  ;;  %v905_v22 = vmin.f32 %v903_v62, %v2227_v51  ;;  %v906_v25 = vmin.f32 %v904_v56, %v2233_v54  ;;  %v938_v56 = vmin.f32 %v2205_v40, %v2213_v44 }
 0x1a2   : > { %v2245_v60 = vpop.f32.mrf.mxu0  ;;  %v2345_v37 = vpop.f32.mrf.mxu1  ;;  %v941_v62 = vmin.f32 %v939_v10, %v2225_v50 }
 0x1a3   : > { %3311 = vst [vmem:[#allocation54_spill] sm:$0xff] %v2345_v37  ;;  %v907_v13 = vmin.f32 %v905_v22, %v2239_v57  ;;  %v908_v7 = vmin.f32 %v906_v25, %v2245_v60  ;;  %v940_v46 = vmin.f32 %v938_v56, %v2221_v48 }
 0x1a4   : > { %v2247_v61 = vpop.f32.mrf.mxu0  ;;  %v2355_v1 = vpop.f32.mrf.mxu1  ;;  %v943_v42 = vmin.f32 %v941_v62, %v2235_v55 }
 0x1a5   : > { %3280 = vst [vmem:[#allocation23_spill] sm:$0xff] %v2247_v61  ;;  %3313 = vst [vmem:[#allocation56_spill] sm:$0xff] %v2355_v1  ;;  %v942_v10 = vmin.f32 %v940_v46, %v2229_v52 }
 0x1a6   : > { %v2251_v63 = vpop.f32.mrf.mxu0  ;;  %v2368_v22 = vpop.f32.mrf.mxu1  ;;  %v945_v50 = vmin.f32 %v943_v42, %v2247_v61 }
 0x1a7   : > { %v909_v37 = vmin.f32 %v907_v13, %v2251_v63  ;;  %3315 = vst [vmem:[#allocation58_spill] sm:$0xff] %v2368_v22  ;;  %v944_v56 = vmin.f32 %v942_v10, %v2241_v58 }
 0x1a8   : > { %v2253_v0 = vpop.f32.mrf.mxu0  ;;  %v2382_v22 = vpop.f32.mrf.mxu1 }
 0x1a9   : > { %3282 = vst [vmem:[#allocation25_spill] sm:$0xff] %v2253_v0  ;;  %3317 = vst [vmem:[#allocation60_spill] sm:$0xff] %v2382_v22  ;;  %v946_v42 = vmin.f32 %v944_v56, %v2253_v0 }
 0x1aa   : > { %v2257_v2 = vpop.f32.mrf.mxu0  ;;  %v2396_v22 = vpop.f32.mrf.mxu1 }
 0x1ab   : > { %v910_v59 = vmin.f32 %v908_v7, %v2257_v2  ;;  %3319 = vst [vmem:[#allocation62_spill] sm:$0xff] %v2396_v22 }
 0x1ac   : > { %v2259_v3 = vpop.f32.mrf.mxu0  ;;  %v2410_v22 = vpop.f32.mrf.mxu1 }
 0x1ad   : > { %3284 = vst [vmem:[#allocation27_spill] sm:$0xff] %v2259_v3  ;;  %v947_v62 = vmin.f32 %v945_v50, %v2259_v3  ;;  %3321 = vst [vmem:[#allocation64_spill] sm:$0xff] %v2410_v22 }
 0x1ae   : > { %v2263_v5 = vpop.f32.mrf.mxu0  ;;  %v2424_v22 = vpop.f32.mrf.mxu1 }
 0x1af   : > { %v911_v25 = vmin.f32 %v909_v37, %v2263_v5  ;;  %3323 = vst [vmem:[#allocation66_spill] sm:$0xff] %v2424_v22 }
 0x1b0   : > { %v2265_v6 = vpop.f32.mrf.mxu0 }
 0x1b1   : > { %3286 = vst [vmem:[#allocation29_spill] sm:$0xff] %v2265_v6  ;;  %v948_v50 = vmin.f32 %v946_v42, %v2265_v6 }
 0x1b2   : > { %v2269_v8 = vpop.f32.mrf.mxu0 }
 0x1b3   : > { %v912_v1 = vmin.f32 %v910_v59, %v2269_v8 }
 0x1b4   : > { %v2271_v9 = vpop.f32.mrf.mxu0 }
 0x1b5   : > { %3288 = vst [vmem:[#allocation31_spill] sm:$0xff] %v2271_v9 }
 0x1b6   : > { %v2275_v11 = vpop.f32.mrf.mxu0 }
 0x1b7   : > { %v913_v7 = vmin.f32 %v911_v25, %v2275_v11  ;;  %v949_v25 = vmin.f32 %v947_v62, %v2271_v9 }
 0x1b8   : > { %v2277_v12 = vpop.f32.mrf.mxu0 }
 0x1b9   : > { %3290 = vst [vmem:[#allocation33_spill] sm:$0xff] %v2277_v12  ;;  %v950_v56 = vmin.f32 %v948_v50, %v2277_v12 }
 0x1ba   : > { %v2281_v14 = vpop.f32.mrf.mxu0 }
 0x1bb   : > { %v914_v44 = vmin.f32 %v912_v1, %v2281_v14 }
 0x1bc   : > { %v2283_v15 = vpop.f32.mrf.mxu0 }
 0x1bd   : > { %3292 = vst [vmem:[#allocation35_spill] sm:$0xff] %v2283_v15  ;;  %v951_v10 = vmin.f32 %v949_v25, %v2283_v15 }
 0x1be   : > { %v2287_v17 = vpop.f32.mrf.mxu0 }
 0x1bf   : > { %v915_v59 = vmin.f32 %v913_v7, %v2287_v17 }
 0x1c0   : > { %v2289_v18 = vpop.f32.mrf.mxu0 }
 0x1c1   : > { %3294 = vst [vmem:[#allocation37_spill] sm:$0xff] %v2289_v18  ;;  %v952_v42 = vmin.f32 %v950_v56, %v2289_v18 }
 0x1c2   : > { %v2293_v20 = vpop.f32.mrf.mxu0 }
 0x1c3   : > { %v916_v37 = vmin.f32 %v914_v44, %v2293_v20 }
 0x1c4   : > { %v2295_v21 = vpop.f32.mrf.mxu0 }
 0x1c5   : > { %3296 = vst [vmem:[#allocation39_spill] sm:$0xff] %v2295_v21  ;;  %v953_v62 = vmin.f32 %v951_v10, %v2295_v21 }
 0x1c6   : > { %v2299_v23 = vpop.f32.mrf.mxu0 }
 0x1c7   : > { %v917_v1 = vmin.f32 %v915_v59, %v2299_v23 }
 0x1c8   : > { %v2301_v24 = vpop.f32.mrf.mxu0 }
 0x1c9   : > { %3298 = vst [vmem:[#allocation41_spill] sm:$0xff] %v2301_v24  ;;  %v954_v50 = vmin.f32 %v952_v42, %v2301_v24 }
 0x1ca   : > { %v2305_v26 = vpop.f32.mrf.mxu0 }
 0x1cb   : > { %v918_v46 = vmin.f32 %v916_v37, %v2305_v26 }
 0x1cc   : > { %v2307_v27 = vpop.f32.mrf.mxu0 }
 0x1cd   : > { %3300 = vst [vmem:[#allocation43_spill] sm:$0xff] %v2307_v27  ;;  %v955_v25 = vmin.f32 %v953_v62, %v2307_v27 }
 0x1ce   : > { %v2311_v29 = vpop.f32.mrf.mxu0 }
 0x1cf   : > { %v919_v44 = vmin.f32 %v917_v1, %v2311_v29 }
 0x1d0   : > { %v2313_v30 = vpop.f32.mrf.mxu0 }
 0x1d1   : > { %3302 = vst [vmem:[#allocation45_spill] sm:$0xff] %v2313_v30  ;;  %v956_v56 = vmin.f32 %v954_v50, %v2313_v30 }
 0x1d2   : > { %v2317_v32 = vpop.f32.mrf.mxu0 }
 0x1d3   : > { %v920_v7 = vmin.f32 %v918_v46, %v2317_v32 }
 0x1d4   : > { %v2319_v33 = vpop.f32.mrf.mxu0 }
 0x1d5   : > { %3304 = vst [vmem:[#allocation47_spill] sm:$0xff] %v2319_v33  ;;  %v957_v10 = vmin.f32 %v955_v25, %v2319_v33  ;;  %v2436_v33 = vpop.f32.mrf.mxu1 }
 0x1d6   : > { %v2323_v35 = vpop.f32.mrf.mxu0  ;;  %3325 = vst [vmem:[#allocation68_spill] sm:$0xff] %v2436_v33  ;;  %v3223_v33 = vlaneseq }
 0x1d7   : > { %v921_v59 = vmin.f32 %v919_v44, %v2323_v35 }
 0x1d8   : > { %v2325_v36 = vpop.f32.mrf.mxu0 }
 0x1d9   : > { %3306 = vst [vmem:[#allocation49_spill] sm:$0xff] %v2325_v36  ;;  %v958_v42 = vmin.f32 %v956_v56, %v2325_v36 }
 0x1da   : > { %v2329_v38 = vpop.f32.mrf.mxu0 }
 0x1db   : > { %v922_v37 = vmin.f32 %v920_v7, %v2329_v38 }
 0x1dc   : > { %v2331_v28 = vpop.f32.mrf.mxu0 }
 0x1dd   : > { %3308 = vst [vmem:[#allocation51_spill] sm:$0xff] %v2331_v28  ;;  %v959_v62 = vmin.f32 %v957_v10, %v2331_v28  ;;  %v2444_v28 = vpop.f32.mrf.mxu1 }
 0x1de   : > { %v2335_v16 = vpop.f32.mrf.mxu0  ;;  %3327 = vst [vmem:[#allocation70_spill] sm:$0xff] %v2444_v28 }
 0x1df   : > { %v923_v1 = vmin.f32 %v921_v59, %v2335_v16 }
 0x1e0   : > { %v2341_v4 = vpop.f32.mrf.mxu0 }
 0x1e1   : > { %3310 = vst [vmem:[#allocation53_spill] sm:$0xff] %v2341_v4 }
 0x1e2   : > { %v2347_v31 = vpop.f32.mrf.mxu0 }
 0x1e3   : > { %v924_v46 = vmin.f32 %v922_v37, %v2347_v31 }
 0x1e4   : > { %v2351_v19 = vpop.f32.mrf.mxu0 }
 0x1e5   : > { %3312 = vst [vmem:[#allocation55_spill] sm:$0xff] %v2351_v19  ;;  %v961_v25 = vmin.f32 %v959_v62, %v2351_v19 }
 0x1e6   : > { %v2359_v34 = vpop.f32.mrf.mxu0 }
 0x1e7   : > { %v925_v44 = vmin.f32 %v923_v1, %v2359_v34 }
 0x1e8   : > { %v2366_v53 = vpop.f32.mrf.mxu0 }
 0x1e9   : > { %3314 = vst [vmem:[#allocation57_spill] sm:$0xff] %v2366_v53 }
 0x1ea   : > { %v2374_v13 = vpop.f32.mrf.mxu0 }
 0x1eb   : > { %v926_v7 = vmin.f32 %v924_v46, %v2374_v13 }
 0x1ec   : > { %v2380_v40 = vpop.f32.mrf.mxu0 }
 0x1ed   : > { %3316 = vst [vmem:[#allocation59_spill] sm:$0xff] %v2380_v40 }
 0x1ee   : > { %v2388_v55 = vpop.f32.mrf.mxu0 }
 0x1ef   : > { %v927_v59 = vmin.f32 %v925_v44, %v2388_v55  ;;  %v960_v44 = vmin.f32 %v958_v42, %v2341_v4 }
 0x1f0   : > { %v2394_v61 = vpop.f32.mrf.mxu0 }
 0x1f1   : > { %3318 = vst [vmem:[#allocation61_spill] sm:$0xff] %v2394_v61  ;;  %v962_v10 = vmin.f32 %v960_v44, %v2366_v53 }
 0x1f2   : > { %v2402_v3 = vpop.f32.mrf.mxu0 }
 0x1f3   : > { %v928_v37 = vmin.f32 %v926_v7, %v2402_v3  ;;  %v963_v7 = vmin.f32 %v961_v25, %v2380_v40  ;;  %v964_v56 = vmin.f32 %v962_v10, %v2394_v61 }
 0x1f4   : > { %v2408_v9 = vpop.f32.mrf.mxu0 }
 0x1f5   : > { %3320 = vst [vmem:[#allocation63_spill] sm:$0xff] %v2408_v9 }
 0x1f6   : > { %v2416_v15 = vpop.f32.mrf.mxu0 }
 0x1f7   : > { %v929_v1 = vmin.f32 %v927_v59, %v2416_v15  ;;  %v965_v59 = vmin.f32 %v963_v7, %v2408_v9  ;;  %v2454_v7 = vshrl.u32 %v3223_v33, 7 }
 0x1f8   : > { %v2422_v21 = vpop.f32.mrf.mxu0 }
 0x1f9   : > { %3322 = vst [vmem:[#allocation65_spill] sm:$0xff] %v2422_v21  ;;  %3330 = vst [vmem:[#allocation73_spill] sm:$0xff] %v2454_v7  ;;  %v2459_v10 = vadd.s32 8, %v2454_v7  ;;  %v2486_v33 = vadd.s32 80, %v2454_v7  ;;  %v2502_v9 = vadd.s32 112, %v2454_v7  ;;  %v2505_v53 = vadd.s32 120, %v2454_v7 }
 0x1fa   : > { %v2430_v27 = vpop.f32.mrf.mxu0  ;;  %v2508_v4 = vadd.s32 128, %v2454_v7  ;;  %v2520_v36 = vadd.s32 160, %v2454_v7  ;;  %v2523_v24 = vadd.s32 168, %v2454_v7  ;;  %v2526_v18 = vadd.s32 176, %v2454_v7 }
 0x1fb   : > { %3324 = vst [vmem:[#allocation67_spill] sm:$0xff] %v2430_v27  ;;  %v930_v46 = vmin.f32 %v928_v37, %v2430_v27  ;;  %3332 = vst [vmem:[#allocation75_spill] sm:$0xff] %v2459_v10  ;;  %v2539_v6 = vadd.s32 184, %v2454_v7  ;;  %v2542_v0 = vadd.s32 192, %v2454_v7 }
 0x1fc   : > { %v2440_v30 = vpop.f32.mrf.mxu0 }
 0x1fd   : > { %v931_v22 = vmin.f32 %v929_v1, %v930_v46  ;;  %3326 = vst [vmem:[#allocation69_spill] sm:$0xff] %v2440_v30  ;;  %v967_v62 = vmin.f32 %v965_v59, %v2440_v30  ;;  %v966_v1 = vmin.f32 %v964_v56, %v2422_v21  ;;  %v2449_v46 = vpop.f32.mrf.mxu1  ;;  %v2462_v59 = vadd.s32 16, %v2454_v7 }
 0x1fe   : > { %3328 = vst [vmem:[#allocation71_spill] sm:$0xff] %v2449_v46  ;;  %v2465_v56 = vadd.s32 24, %v2454_v7  ;;  %v2496_v30 = vadd.s32 96, %v2454_v7  ;;  %v2499_v21 = vadd.s32 104, %v2454_v7 }
 0x1ff   : > { %v932_v50 = vrot.slane %v931_v22, 4  ;;  %v968_v25 = vmin.f32 %v966_v1, %v967_v62  ;;  %v2451_v40 = vpop.f32.mrf.mxu1  ;;  %3333 = vst [vmem:[#allocation76_spill] sm:$0xff] %v2462_v59  ;;  %v2468_v62 = vadd.s32 32, %v2454_v7  ;;  %v2474_v1 = vadd.s32 48, %v2454_v7 }
 0x200   : > { %3329 = vst [vmem:[#allocation72_spill] sm:$0xff] %v2451_v40  ;;  %3334 = vst [vmem:[#allocation77_spill] sm:$0xff] %v2465_v56 }
 0x201   : > { %v933_v37 = vmin.f32 %v931_v22, %v932_v50  ;;  %v969_v44 = vrot.slane %v968_v25, 4  ;;  %v2456_v28 = vpop.f32.mrf.mxu1 }
 0x202   : > { %3331 = vst [vmem:[#allocation74_spill] sm:$0xff] %v2456_v28  ;;  %v2489_v28 = vadd.s32 88, %v2454_v7 }
 0x203   : > { %v934_v42 = vrot.slane %v933_v37, 2  ;;  %v970_v50 = vmin.f32 %v968_v25, %v969_v44  ;;  %v2480_v25 = vadd.s32 64, %v2454_v7  ;;  %v2483_v44 = vadd.s32 72, %v2454_v7  ;;  %v2491_v46 = vpop.f32.mrf.mxu1 }
 0x204   : > { %3335 = vst [vmem:[#allocation78_spill] sm:$0xff] %v2491_v46  ;;  %v2511_v46 = vadd.s32 136, %v2454_v7 }
 0x205   : > { %v935_v19 = vmin.f32 %v933_v37, %v934_v42  ;;  %v2471_v37 = vadd.s32 40, %v2454_v7  ;;  %v2477_v42 = vadd.s32 56, %v2454_v7  ;;  %v971_v61 = vrot.slane %v970_v50, 2  ;;  %v2528_v12 = vpop.f32.mrf.mxu1 }
 0x206   : > { %3337 = vst [vmem:[#allocation80_spill] sm:$0xff] %v2528_v12  ;;  %v2545_v12 = vadd.s32 200, %v2454_v7 }
 0x207   : > { %v936_v22 = vrot.slane %v935_v19, 1  ;;  %v2547_v58 = vmin.f32 %v970_v50, %v971_v61  ;;  %v2565_v50 = vpop.f32.mrf.mxu1 }
 0x208   : > { %3340 = vst [vmem:[#allocation83_spill] sm:$0xff] %v2565_v50 }
 0x209   : > { %v2493_v40 = vmin.f32 %v935_v19, %v936_v22  ;;  %v2514_v19 = vadd.s32 144, %v2454_v7  ;;  %v2517_v22 = vadd.s32 152, %v2454_v7 }
 0x20b   : > { %3336 = vst [vmem:[#allocation79_spill] sm:$0xff] %v2493_v40  ;;  %vm1008_vm1 = vcmp.le.f32.partialorder %v2203_v39, %v2493_v40  ;;  %vm1010_vm2 = vcmp.le.f32.partialorder %v2207_v41, %v2493_v40  ;;  %vm1012_vm3 = vcmp.le.f32.partialorder %v2211_v43, %v2493_v40  ;;  %vm1014_vm4 = vcmp.le.f32.partialorder %v2215_v45, %v2493_v40 }
 0x20c   : > { %v2550_v39 = vadd.s32 208, %v2454_v7  ;;  %v2553_v41 = vadd.s32 216, %v2454_v7  ;;  %v2556_v43 = vadd.s32 224, %v2454_v7  ;;  %v2559_v45 = vadd.s32 232, %v2454_v7 }
 0x20d   : > { %v1072_v52 = vsel %vm1008_vm1, %v2454_v7, 256  ;;  %v1074_v48 = vsel %vm1010_vm2, %v2459_v10, 256  ;;  %v1076_v27 = vsel %vm1012_vm3, %v2462_v59, 256  ;;  %v1078_v61 = vsel %vm1014_vm4, %v2465_v56, 256  ;;  %v2590_v59 = vpop.f32.mrf.mxu1 }
 0x20e   : > { %3338 = vst [vmem:[#allocation81_spill] sm:$0xff] %v2550_v39  ;;  %3339 = vst [vmem:[#allocation82_spill] sm:$0xff] %v2553_v41  ;;  %v2568_v39 = vadd.s32 240, %v2454_v7  ;;  %v2571_v41 = vadd.s32 248, %v2454_v7  ;;  %vm1016_vm5 = vcmp.le.f32.partialorder %v2219_v47, %v2493_v40  ;;  %vm1018_vm6 = vcmp.le.f32.partialorder %v2223_v49, %v2493_v40 }
 0x20f   : > { %vm1020_vm7 = vcmp.le.f32.partialorder %v2227_v51, %v2493_v40  ;;  %vm1022_vm8 = vcmp.le.f32.partialorder %v2233_v54, %v2493_v40  ;;  %vm1024_vm9 = vcmp.le.f32.partialorder %v2239_v57, %v2493_v40  ;;  %vm1026_vm10 = vcmp.le.f32.partialorder %v2245_v60, %v2493_v40  ;;  %3341 = vst [vmem:[#allocation84_spill] sm:$0xff] %v2590_v59 }
 0x210   : > { %vm1028_vm11 = vcmp.le.f32.partialorder %v2251_v63, %v2493_v40  ;;  %vm1136_vm12 = vcmp.lt.s32.totalorder %v1072_v52, %v1076_v27  ;;  %vm1138_vm13 = vcmp.lt.s32.totalorder %v1074_v48, %v1078_v61  ;;  %v1080_v47 = vsel %vm1016_vm5, %v2468_v62, 256 }
 0x211   : > { %v1082_v49 = vsel %vm1018_vm6, %v2471_v37, 256  ;;  %v1137_v56 = vsel %vm1136_vm12, %v1072_v52, %v1076_v27  ;;  %v1139_v10 = vsel %vm1138_vm13, %v1074_v48, %v1078_v61  ;;  %vm1030_vm14 = vcmp.le.f32.partialorder %v2257_v2, %v2493_v40  ;;  %v2616_v61 = vpop.f32.mrf.mxu1 }
 0x212   : > { %vm1032_vm15 = vcmp.le.f32.partialorder %v2263_v5, %v2493_v40  ;;  %vm1140_vm0 = vcmp.lt.s32.totalorder %v1137_v56, %v1080_v47  ;;  %vm1142_vm1 = vcmp.lt.s32.totalorder %v1139_v10, %v1082_v49  ;;  %v1084_v50 = vsel %vm1020_vm7, %v2474_v1, 256 }
 0x213   : > { %v1086_v48 = vsel %vm1022_vm8, %v2477_v42, 256  ;;  %v1141_v52 = vsel %vm1140_vm0, %v1137_v56, %v1080_v47  ;;  %v1143_v27 = vsel %vm1142_vm1, %v1139_v10, %v1082_v49  ;;  %vm1034_vm2 = vcmp.le.f32.partialorder %v2269_v8, %v2493_v40 }
 0x214   : > { %vm1036_vm3 = vcmp.le.f32.partialorder %v2275_v11, %v2493_v40  ;;  %vm1144_vm4 = vcmp.lt.s32.totalorder %v1141_v52, %v1084_v50  ;;  %vm1146_vm5 = vcmp.lt.s32.totalorder %v1143_v27, %v1086_v48  ;;  %v1088_v51 = vsel %vm1024_vm9, %v2480_v25, 256 }
 0x215   : > { %v1090_v54 = vsel %vm1026_vm10, %v2483_v44, 256  ;;  %v1145_v56 = vsel %vm1144_vm4, %v1141_v52, %v1084_v50  ;;  %v1147_v10 = vsel %vm1146_vm5, %v1143_v27, %v1086_v48  ;;  %vm1038_vm6 = vcmp.le.f32.partialorder %v2281_v14, %v2493_v40  ;;  %v2642_v52 = vpop.f32.mrf.mxu1 }
 0x216   : > { %vm1040_vm7 = vcmp.le.f32.partialorder %v2287_v17, %v2493_v40  ;;  %vm1148_vm8 = vcmp.lt.s32.totalorder %v1145_v56, %v1088_v51  ;;  %vm1150_vm12 = vcmp.lt.s32.totalorder %v1147_v10, %v1090_v54  ;;  %v1092_v57 = vsel %vm1028_vm11, %v2486_v33, 256  ;;  %3342 = vst [vmem:[#allocation85_spill] sm:$0xff] %v2642_v52 }
 0x217   : > { %v1094_v60 = vsel %vm1030_vm14, %v2489_v28, 256  ;;  %v1149_v50 = vsel %vm1148_vm8, %v1145_v56, %v1088_v51  ;;  %v1151_v47 = vsel %vm1150_vm12, %v1147_v10, %v1090_v54  ;;  %vm1042_vm9 = vcmp.le.f32.partialorder %v2293_v20, %v2493_v40  ;;  %v2668_v10 = vpop.f32.mrf.mxu1 }
 0x218   : > { %vm1044_vm10 = vcmp.le.f32.partialorder %v2299_v23, %v2493_v40  ;;  %vm1152_vm13 = vcmp.lt.s32.totalorder %v1149_v50, %v1092_v57  ;;  %vm1154_vm0 = vcmp.lt.s32.totalorder %v1151_v47, %v1094_v60  ;;  %v1096_v63 = vsel %vm1032_vm15, %v2496_v30, 256 }
 0x219   : > { %v1098_v2 = vsel %vm1034_vm2, %v2499_v21, 256  ;;  %v1153_v49 = vsel %vm1152_vm13, %v1149_v50, %v1092_v57  ;;  %v1155_v48 = vsel %vm1154_vm0, %v1151_v47, %v1094_v60  ;;  %vm1046_vm11 = vcmp.le.f32.partialorder %v2305_v26, %v2493_v40 }
 0x21a   : > { %vm1048_vm14 = vcmp.le.f32.partialorder %v2311_v29, %v2493_v40  ;;  %vm1156_vm1 = vcmp.lt.s32.totalorder %v1153_v49, %v1096_v63  ;;  %vm1158_vm4 = vcmp.lt.s32.totalorder %v1155_v48, %v1098_v2  ;;  %v1100_v5 = vsel %vm1036_vm3, %v2502_v9, 256 }
 0x21b   : > { %v1102_v8 = vsel %vm1038_vm6, %v2505_v53, 256  ;;  %v1157_v27 = vsel %vm1156_vm1, %v1153_v49, %v1096_v63  ;;  %v1159_v51 = vsel %vm1158_vm4, %v1155_v48, %v1098_v2  ;;  %vm1050_vm15 = vcmp.le.f32.partialorder %v2317_v32, %v2493_v40  ;;  %v2694_v63 = vpop.f32.mrf.mxu1 }
 0x21c   : > { %vm1052_vm2 = vcmp.le.f32.partialorder %v2323_v35, %v2493_v40  ;;  %vm1160_vm5 = vcmp.lt.s32.totalorder %v1157_v27, %v1100_v5  ;;  %vm1162_vm8 = vcmp.lt.s32.totalorder %v1159_v51, %v1102_v8  ;;  %v1104_v11 = vsel %vm1040_vm7, %v2508_v4, 256  ;;  %3343 = vst [vmem:[#allocation86_spill] sm:$0xff] %v2694_v63  ;;  %v3384_v63 = vld [vmem:[#allocation59_spill] sm:$0xff] }
 0x21d   : > { %v1106_v14 = vsel %vm1042_vm9, %v2511_v46, 256  ;;  %v1161_v54 = vsel %vm1160_vm5, %v1157_v27, %v1100_v5  ;;  %v1163_v56 = vsel %vm1162_vm8, %v1159_v51, %v1102_v8  ;;  %vm1054_vm3 = vcmp.le.f32.partialorder %v2329_v38, %v2493_v40  ;;  %v2720_v8 = vpop.f32.mrf.mxu1  ;;  %v3344_v27 = vld [vmem:[#allocation67_spill] sm:$0xff] }
 0x21e   : > { %vm1056_vm6 = vcmp.le.f32.partialorder %v2335_v16, %v2493_v40  ;;  %vm1164_vm12 = vcmp.lt.s32.totalorder %v1161_v54, %v1104_v11  ;;  %vm1166_vm13 = vcmp.lt.s32.totalorder %v1163_v56, %v1106_v14  ;;  %v1108_v17 = vsel %vm1044_vm10, %v2514_v19, 256  ;;  %v3346_v16 = vld [vmem:[#allocation81_spill] sm:$0xff] }
 0x21f   : > { %v1110_v20 = vsel %vm1046_vm11, %v2517_v22, 256  ;;  %v1165_v57 = vsel %vm1164_vm12, %v1161_v54, %v1104_v11  ;;  %v1167_v60 = vsel %vm1166_vm13, %v1163_v56, %v1106_v14  ;;  %vm1058_vm7 = vcmp.le.f32.partialorder %v2347_v31, %v2493_v40  ;;  %v3347_v14 = vld [vmem:[#allocation82_spill] sm:$0xff] }
 0x220   : > { %vm1060_vm9 = vcmp.le.f32.partialorder %v2359_v34, %v2493_v40  ;;  %vm1168_vm0 = vcmp.lt.s32.totalorder %v1165_v57, %v1108_v17  ;;  %vm1170_vm1 = vcmp.lt.s32.totalorder %v1167_v60, %v1110_v20  ;;  %v1112_v23 = vsel %vm1048_vm14, %v2520_v36, 256 }
 0x221   : > { %v1114_v26 = vsel %vm1050_vm15, %v2523_v24, 256  ;;  %v1169_v50 = vsel %vm1168_vm0, %v1165_v57, %v1108_v17  ;;  %v1171_v47 = vsel %vm1170_vm1, %v1167_v60, %v1110_v20  ;;  %vm1062_vm10 = vcmp.le.f32.partialorder %v2374_v13, %v2493_v40 }
 0x222   : > { %vm1064_vm11 = vcmp.le.f32.partialorder %v2388_v55, %v2493_v40  ;;  %vm1172_vm4 = vcmp.lt.s32.totalorder %v1169_v50, %v1112_v23  ;;  %vm1174_vm5 = vcmp.lt.s32.totalorder %v1171_v47, %v1114_v26  ;;  %v1116_v29 = vsel %vm1052_vm2, %v2526_v18, 256  ;;  %v3349_v55 = vld [vmem:[#allocation11_spill] sm:$0xff] }
 0x223   : > { %v1118_v32 = vsel %vm1054_vm3, %v2539_v6, 256  ;;  %v1173_v2 = vsel %vm1172_vm4, %v1169_v50, %v1112_v23  ;;  %v1175_v49 = vsel %vm1174_vm5, %v1171_v47, %v1114_v26  ;;  %vm1066_vm14 = vcmp.le.f32.partialorder %v2402_v3, %v2493_v40  ;;  %v2750_v23 = vpop.f32.mrf.mxu1  ;;  %v3350_v3 = vld [vmem:[#allocation13_spill] sm:$0xff]  ;;  %v3351_v47 = vld [vmem:[#allocation12_spill] sm:$0xff] }
 0x224   : > { %vm1068_vm15 = vcmp.le.f32.partialorder %v2416_v15, %v2493_v40  ;;  %vm1176_vm8 = vcmp.lt.s32.totalorder %v1173_v2, %v1116_v29  ;;  %vm1178_vm12 = vcmp.lt.s32.totalorder %v1175_v49, %v1118_v32  ;;  %v1120_v35 = vsel %vm1056_vm6, %v2542_v0, 256  ;;  %3348 = vst [vmem:[#allocation67_spill] sm:$0xff] %v2750_v23  ;;  %v3352_v15 = vld [vmem:[#allocation14_spill] sm:$0xff]  ;;  %v3383_v23 = vld [vmem:[#allocation57_spill] sm:$0xff] }
 0x225   : > { %v1122_v38 = vsel %vm1058_vm7, %v2545_v12, 256  ;;  %v1177_v48 = vsel %vm1176_vm8, %v1173_v2, %v1116_v29  ;;  %v1179_v5 = vsel %vm1178_vm12, %v1175_v49, %v1118_v32  ;;  %vm1070_vm2 = vcmp.le.f32.partialorder %v3344_v27, %v2493_v40  ;;  %v3353_v49 = vld [vmem:[#allocation76_spill] sm:$0xff]  ;;  %v3385_v40 = vld [vmem:[#allocation18_spill] sm:$0xff] }
 0x226   : > { %vm1180_vm3 = vcmp.lt.s32.totalorder %v1177_v48, %v1120_v35  ;;  %vm1182_vm13 = vcmp.lt.s32.totalorder %v1179_v5, %v1122_v38  ;;  %v3345_v51 = vrot.slane %v2547_v58, 1  ;;  %v1124_v31 = vsel %vm1060_vm9, %v3346_v16, 256 }
 0x227   : > { %v1126_v54 = vsel %vm1062_vm10, %v3347_v14, 256  ;;  %v1181_v56 = vsel %vm1180_vm3, %v1177_v48, %v1120_v35  ;;  %v1183_v17 = vsel %vm1182_vm13, %v1179_v5, %v1122_v38  ;;  %v1128_v20 = vsel %vm1064_vm11, %v2556_v43, 256  ;;  %v2762_v38 = vpop.f32.mrf.mxu1  ;;  %v3354_v48 = vld [vmem:[#allocation15_spill] sm:$0xff] }
 0x228   : > { %v2727_v11 = vmin.f32 %v2547_v58, %v3345_v51  ;;  %v1130_v58 = vsel %vm1066_vm14, %v2559_v45, 256  ;;  %vm1184_vm6 = vcmp.lt.s32.totalorder %v1181_v56, %v1124_v31  ;;  %vm1186_vm7 = vcmp.lt.s32.totalorder %v1183_v17, %v1126_v54  ;;  %v3355_v5 = vld [vmem:[#allocation75_spill] sm:$0xff]  ;;  %v3356_v51 = vld [vmem:[#allocation77_spill] sm:$0xff] }
 0x229   : > { %v1132_v34 = vsel %vm1068_vm15, %v2568_v39, 256  ;;  %v1134_v13 = vsel %vm1070_vm2, %v2571_v41, 256  ;;  %v1185_v57 = vsel %vm1184_vm6, %v1181_v56, %v1124_v31  ;;  %v1187_v60 = vsel %vm1186_vm7, %v1183_v17, %v1126_v54  ;;  %v3357_v56 = vld [vmem:[#allocation16_spill] sm:$0xff] }
 0x22a   : > { %vm1188_vm9 = vcmp.lt.s32.totalorder %v1185_v57, %v1128_v20  ;;  %vm1190_vm0 = vcmp.lt.s32.totalorder %v1187_v60, %v1130_v58  ;;  %vm1009_vm1 = vcmp.le.f32.partialorder %v3349_v55, %v2727_v11  ;;  %vm1013_vm10 = vcmp.le.f32.partialorder %v3350_v3, %v2727_v11 }
 0x22b   : > { %v1189_v26 = vsel %vm1188_vm9, %v1185_v57, %v1128_v20  ;;  %v1191_v50 = vsel %vm1190_vm0, %v1187_v60, %v1130_v58  ;;  %vm1011_vm11 = vcmp.le.f32.partialorder %v3351_v47, %v2727_v11  ;;  %vm1015_vm4 = vcmp.le.f32.partialorder %v3352_v15, %v2727_v11  ;;  %v3358_v20 = vld [vmem:[#allocation17_spill] sm:$0xff]  ;;  %v3359_v58 = vld [vmem:[#allocation19_spill] sm:$0xff]  ;;  %v2775_v57 = vpop.f32.mrf.mxu1 }
 0x22c   : > { %vm1192_vm5 = vcmp.lt.s32.totalorder %v1189_v26, %v1132_v34  ;;  %vm1194_vm14 = vcmp.lt.s32.totalorder %v1191_v50, %v1134_v13  ;;  %v1073_v2 = vsel %vm1009_vm1, %v2454_v7, 256  ;;  %v1077_v35 = vsel %vm1013_vm10, %v3353_v49, 256  ;;  %3360 = vst [vmem:[#allocation81_spill] sm:$0xff] %v2775_v57  ;;  %v3382_v57 = vld [vmem:[#allocation55_spill] sm:$0xff] }
 0x22d   : > { %v1193_v29 = vsel %vm1192_vm5, %v1189_v26, %v1132_v34  ;;  %v1195_v32 = vsel %vm1194_vm14, %v1191_v50, %v1134_v13  ;;  %vm1017_vm8 = vcmp.le.f32.partialorder %v3354_v48, %v2727_v11  ;;  %v1075_v27 = vsel %vm1011_vm11, %v3355_v5, 256 }
 0x22e   : > { %vm1196_vm15 = vcmp.lt.s32.totalorder %v1193_v29, %v1195_v32  ;;  %v1079_v31 = vsel %vm1015_vm4, %v3356_v51, 256  ;;  %vm1019_vm12 = vcmp.le.f32.partialorder %v3357_v56, %v2727_v11  ;;  %vm1021_vm2 = vcmp.le.f32.partialorder %v3358_v20, %v2727_v11  ;;  %v3364_v20 = vld [vmem:[#allocation25_spill] sm:$0xff] }
 0x22f   : > { %v1197_v54 = vsel %vm1196_vm15, %v1193_v29, %v1195_v32  ;;  %vm1207_vm3 = vcmp.lt.s32.totalorder %v1073_v2, %v1077_v35  ;;  %vm1023_vm13 = vcmp.le.f32.partialorder %v3359_v58, %v2727_v11  ;;  %v1081_v34 = vsel %vm1017_vm8, %v2468_v62, 256  ;;  %v2779_v29 = vpop.f32.mrf.mxu1  ;;  %v3361_v32 = vld [vmem:[#allocation21_spill] sm:$0xff] }
 0x230   : > { %v1198_v17 = vrot.slane %v1197_v54, 4  ;;  %v1208_v13 = vsel %vm1207_vm3, %v1073_v2, %v1077_v35  ;;  %vm1209_vm6 = vcmp.lt.s32.totalorder %v1075_v27, %v1079_v31  ;;  %v1083_v60 = vsel %vm1019_vm12, %v2471_v37, 256 }
 0x231   : > { %v1210_v55 = vsel %vm1209_vm6, %v1075_v27, %v1079_v31  ;;  %vm1211_vm9 = vcmp.lt.s32.totalorder %v1208_v13, %v1081_v34  ;;  %v1085_v26 = vsel %vm1021_vm2, %v2474_v1, 256  ;;  %vm1025_vm11 = vcmp.le.f32.partialorder %v3361_v32, %v2727_v11  ;;  %v3362_v31 = vld [vmem:[#allocation23_spill] sm:$0xff]  ;;  %v2790_v56 = vpop.f32.mrf.mxu1 }
 0x232   : > { %vm1199_vm7 = vcmp.lt.s32.totalorder %v1197_v54, %v1198_v17  ;;  %v1212_v50 = vsel %vm1211_vm9, %v1208_v13, %v1081_v34  ;;  %vm1213_vm0 = vcmp.lt.s32.totalorder %v1210_v55, %v1083_v60  ;;  %v1087_v2 = vsel %vm1023_vm13, %v2477_v42, 256  ;;  %3363 = vst [vmem:[#allocation82_spill] sm:$0xff] %v2790_v56  ;;  %v3381_v56 = vld [vmem:[#allocation53_spill] sm:$0xff] }
 0x233   : > { %v1200_v3 = vsel %vm1199_vm7, %v1197_v54, %v1198_v17  ;;  %v1214_v15 = vsel %vm1213_vm0, %v1210_v55, %v1083_v60  ;;  %vm1215_vm1 = vcmp.lt.s32.totalorder %v1212_v50, %v1085_v26  ;;  %vm1027_vm5 = vcmp.le.f32.partialorder %v3362_v31, %v2727_v11  ;;  %v2797_v60 = vpop.f32.mrf.mxu1  ;;  %v3366_v55 = vld [vmem:[#allocation27_spill] sm:$0xff] }
 0x234   : > { %v1201_v47 = vrot.slane %v1200_v3, 2  ;;  %v1216_v48 = vsel %vm1215_vm1, %v1212_v50, %v1085_v26  ;;  %vm1217_vm4 = vcmp.lt.s32.totalorder %v1214_v15, %v1087_v2  ;;  %v1089_v54 = vsel %vm1025_vm11, %v2480_v25, 256  ;;  %3365 = vst [vmem:[#allocation11_spill] sm:$0xff] %v2797_v60  ;;  %v3373_v31 = vld [vmem:[#allocation39_spill] sm:$0xff] }
 0x235   : > { %v1218_v17 = vsel %vm1217_vm4, %v1214_v15, %v1087_v2  ;;  %vm1219_vm15 = vcmp.lt.s32.totalorder %v1216_v48, %v1089_v54  ;;  %vm1029_vm8 = vcmp.le.f32.partialorder %v3364_v20, %v2727_v11  ;;  %v1091_v58 = vsel %vm1027_vm5, %v2483_v44, 256  ;;  %v2806_v50 = vpop.f32.mrf.mxu1  ;;  %v3369_v15 = vld [vmem:[#allocation31_spill] sm:$0xff]  ;;  %v3370_v2 = vld [vmem:[#allocation33_spill] sm:$0xff] }
 0x236   : > { %vm1202_vm10 = vcmp.lt.s32.totalorder %v1200_v3, %v1201_v47  ;;  %v1220_v13 = vsel %vm1219_vm15, %v1216_v48, %v1089_v54  ;;  %vm1221_vm12 = vcmp.lt.s32.totalorder %v1218_v17, %v1091_v58  ;;  %vm1031_vm2 = vcmp.le.f32.partialorder %v3366_v55, %v2727_v11  ;;  %3367 = vst [vmem:[#allocation13_spill] sm:$0xff] %v2806_v50  ;;  %v3374_v54 = vld [vmem:[#allocation41_spill] sm:$0xff]  ;;  %v3380_v50 = vld [vmem:[#allocation51_spill] sm:$0xff] }
 0x237   : > { %v1203_v35 = vsel %vm1202_vm10, %v1200_v3, %v1201_v47  ;;  %v1093_v3 = vsel %vm1029_vm8, %v2486_v33, 256  ;;  %v1222_v26 = vsel %vm1221_vm12, %v1218_v17, %v1091_v58  ;;  %v3368_v47 = vld [vmem:[#allocation29_spill] sm:$0xff]  ;;  %vm1035_vm9 = vcmp.le.f32.partialorder %v3369_v15, %v2727_v11  ;;  %v3375_v17 = vld [vmem:[#allocation43_spill] sm:$0xff] }
 0x238   : > { %v1204_v27 = vrot.slane %v1203_v35, 1  ;;  %vm1223_vm6 = vcmp.lt.s32.totalorder %v1220_v13, %v1093_v3  ;;  %vm1033_vm7 = vcmp.le.f32.partialorder %v3368_v47, %v2727_v11  ;;  %v1095_v32 = vsel %vm1031_vm2, %v2489_v28, 256  ;;  %v3376_v20 = vld [vmem:[#allocation45_spill] sm:$0xff]  ;;  %v3377_v58 = vld [vmem:[#allocation47_spill] sm:$0xff] }
 0x239   : > { %vm1037_vm0 = vcmp.le.f32.partialorder %v3370_v2, %v2727_v11  ;;  %v1224_v48 = vsel %vm1223_vm6, %v1220_v13, %v1093_v3  ;;  %vm1225_vm10 = vcmp.lt.s32.totalorder %v1222_v26, %v1095_v32  ;;  %vm1043_vm4 = vcmp.le.f32.partialorder %v3373_v31, %v2727_v11  ;;  %v3378_v13 = vld [vmem:[#allocation49_spill] sm:$0xff]  ;;  %v2832_v3 = vpop.f32.mrf.mxu1 }
 0x23a   : > { %vm1205_vm14 = vcmp.lt.s32.totalorder %v1203_v35, %v1204_v27  ;;  %vm1045_vm5 = vcmp.le.f32.partialorder %v3374_v54, %v2727_v11  ;;  %v1097_v55 = vsel %vm1033_vm7, %v2496_v30, 256  ;;  %3379 = vst [vmem:[#allocation12_spill] sm:$0xff] %v2832_v3  ;;  %v1226_v47 = vsel %vm1225_vm10, %v1222_v26, %v1095_v32  ;;  %v3388_v2 = vld [vmem:[#allocation61_spill] sm:$0xff] }
 0x23b   : > { %v2795_v34 = vsel %vm1205_vm14, %v1203_v35, %v1204_v27  ;;  %v3371_v35 = vld [vmem:[#allocation35_spill] sm:$0xff]  ;;  %v3372_v27 = vld [vmem:[#allocation37_spill] sm:$0xff]  ;;  %vm1047_vm14 = vcmp.le.f32.partialorder %v3375_v17, %v2727_v11  ;;  %vm1227_vm13 = vcmp.lt.s32.totalorder %v1224_v48, %v1097_v55  ;;  %vm1055_vm3 = vcmp.le.f32.partialorder %v3380_v50, %v2727_v11  ;;  %v2866_v60 = vpop.f32.mrf.mxu1 }
 0x23c   : > { %vm1039_vm1 = vcmp.le.f32.partialorder %v3371_v35, %v2727_v11  ;;  %vm1041_vm11 = vcmp.le.f32.partialorder %v3372_v27, %v2727_v11  ;;  %vm1278_vm2 = vcmp.eq.s32.totalorder %v2454_v7, %v2795_v34  ;;  %vm1280_vm6 = vcmp.eq.s32.totalorder %v3355_v5, %v2795_v34  ;;  %v3386_v7 = vld [vmem:[#allocation22_spill] sm:$0xff]  ;;  %3387 = vst [vmem:[#allocation14_spill] sm:$0xff] %v2866_v60 }
 0x23d   : > { %vm1057_vm8 = vcmp.le.f32.partialorder %v3381_v56, %v2727_v11  ;;  %vm1059_vm12 = vcmp.le.f32.partialorder %v3382_v57, %v2727_v11  ;;  %vm1061_vm7 = vcmp.le.f32.partialorder %v3383_v23, %v2727_v11  ;;  %vm1063_vm15 = vcmp.le.f32.partialorder %v3384_v63, %v2727_v11  ;;  %v2909_v50 = vpop.f32.mrf.mxu1 }
 0x23e   : > { %v1099_v26 = vsel %vm1035_vm9, %v2499_v21, 256  ;;  %v1101_v32 = vsel %vm1037_vm0, %v2502_v9, 256  ;;  %v1103_v52 = vsel %vm1039_vm1, %v2505_v53, 256  ;;  %v1105_v59 = vsel %vm1041_vm11, %v2508_v4, 256 }
 0x23f   : > { %v1342_v5 = vsel %vm1278_vm2, %v3385_v40, 0.0  ;;  %v1344_v15 = vsel %vm1280_vm6, %v3386_v7, 0.0  ;;  %v1228_v3 = vsel %vm1227_vm13, %v1224_v48, %v1097_v55  ;;  %vm1229_vm9 = vcmp.lt.s32.totalorder %v1226_v47, %v1099_v26 }
 0x240   : > { %vm1282_vm0 = vcmp.eq.s32.totalorder %v3353_v49, %v2795_v34  ;;  %vm1065_vm10 = vcmp.le.f32.partialorder %v3388_v2, %v2727_v11  ;;  %v1107_v35 = vsel %vm1043_vm4, %v2511_v46, 256  ;;  %v1109_v40 = vsel %vm1045_vm5, %v2514_v19, 256 }
 0x241   : > { %v1111_v7 = vsel %vm1047_vm14, %v2517_v22, 256  ;;  %vm3389_vm13 = vcmp.le.f32.partialorder %v3376_v20, %v2727_v11  ;;  %vm3390_vm1 = vcmp.le.f32.partialorder %v3377_v58, %v2727_v11  ;;  %vm3391_vm11 = vcmp.le.f32.partialorder %v3378_v13, %v2727_v11  ;;  %v3392_v20 = vld [vmem:[#allocation63_spill] sm:$0xff]  ;;  %v3393_v58 = vld [vmem:[#allocation26_spill] sm:$0xff] }
 0x242   : > { %v1113_v48 = vsel %vm3389_vm13, %v2520_v36, 256  ;;  %v1115_v27 = vsel %vm3390_vm1, %v2523_v24, 256  ;;  %v1117_v31 = vsel %vm3391_vm11, %v2526_v18, 256  ;;  %v1119_v54 = vsel %vm1055_vm3, %v2539_v6, 256 }
 0x243   : > { %vm1284_vm4 = vcmp.eq.s32.totalorder %v3356_v51, %v2795_v34  ;;  %v1406_v17 = vadd.f32 %v1344_v15, %v1342_v5  ;;  %vm1067_vm5 = vcmp.le.f32.partialorder %v3392_v20, %v2727_v11  ;;  %v1230_v55 = vsel %vm1229_vm9, %v1226_v47, %v1099_v26  ;;  %v3394_v15 = vld [vmem:[#allocation65_spill] sm:$0xff]  ;;  %v3395_v26 = vld [vmem:[#allocation30_spill] sm:$0xff] }
 0x244   : > { %vm1231_vm14 = vcmp.lt.s32.totalorder %v1228_v3, %v1101_v32  ;;  %v1346_v60 = vsel %vm1282_vm0, %v3393_v58, 0.0  ;;  %v1121_v13 = vsel %vm1057_vm8, %v2542_v0, 256  ;;  %vm1233_vm2 = vcmp.lt.s32.totalorder %v1230_v55, %v1103_v52 }
 0x245   : > { %v1232_v49 = vsel %vm1231_vm14, %v1228_v3, %v1101_v32  ;;  %vm1286_vm3 = vcmp.eq.s32.totalorder %v2468_v62, %v2795_v34  ;;  %v1407_v5 = vadd.f32 %v1406_v17, %v1346_v60  ;;  %vm1069_vm6 = vcmp.le.f32.partialorder %v3394_v15, %v2727_v11  ;;  %v3396_v60 = vld [vmem:[#allocation69_spill] sm:$0xff] }
 0x246   : > { %v1234_v47 = vsel %vm1233_vm2, %v1230_v55, %v1103_v52  ;;  %vm1235_vm9 = vcmp.lt.s32.totalorder %v1232_v49, %v1105_v59  ;;  %v1348_v58 = vsel %vm1284_vm4, %v3395_v26, 0.0  ;;  %v1123_v56 = vsel %vm1059_vm12, %v2545_v12, 256  ;;  %v3397_v52 = vld [vmem:[#allocation34_spill] sm:$0xff] }
 0x247   : > { %v1236_v3 = vsel %vm1235_vm9, %v1232_v49, %v1105_v59  ;;  %vm1237_vm8 = vcmp.lt.s32.totalorder %v1234_v47, %v1107_v35  ;;  %vm1288_vm0 = vcmp.eq.s32.totalorder %v2471_v37, %v2795_v34  ;;  %v1408_v32 = vadd.f32 %v1407_v5, %v1348_v58  ;;  %v2929_v59 = vpop.f32.mrf.mxu1  ;;  %v3399_v58 = vld [vmem:[#allocation38_spill] sm:$0xff] }
 0x248   : > { %vm1071_vm13 = vcmp.le.f32.partialorder %v3396_v60, %v2727_v11  ;;  %v1238_v17 = vsel %vm1237_vm8, %v1234_v47, %v1107_v35  ;;  %vm1239_vm1 = vcmp.lt.s32.totalorder %v1236_v3, %v1109_v40  ;;  %v1350_v55 = vsel %vm1286_vm3, %v3397_v52, 0.0  ;;  %3398 = vst [vmem:[#allocation15_spill] sm:$0xff] %v2929_v59 }
 0x249   : > { %v1125_v26 = vsel %vm1061_vm7, %v3346_v16, 256  ;;  %v1240_v57 = vsel %vm1239_vm1, %v1236_v3, %v1109_v40  ;;  %vm1241_vm12 = vcmp.lt.s32.totalorder %v1238_v17, %v1111_v7  ;;  %vm1290_vm11 = vcmp.eq.s32.totalorder %v2474_v1, %v2795_v34  ;;  %v3400_v3 = vld [vmem:[#allocation42_spill] sm:$0xff] }
 0x24a   : > { %v1409_v49 = vadd.f32 %v1408_v32, %v1350_v55  ;;  %v1242_v5 = vsel %vm1241_vm12, %v1238_v17, %v1111_v7  ;;  %vm1243_vm4 = vcmp.lt.s32.totalorder %v1240_v57, %v1113_v48  ;;  %v1352_v35 = vsel %vm1288_vm0, %v3399_v58, 0.0  ;;  %v2945_v17 = vpop.f32.mrf.mxu1  ;;  %v3401_v55 = vld [vmem:[#allocation46_spill] sm:$0xff] }
 0x24b   : > { %v1127_v47 = vsel %vm1063_vm15, %v3347_v14, 256  ;;  %v1244_v52 = vsel %vm1243_vm4, %v1240_v57, %v1113_v48  ;;  %vm1245_vm14 = vcmp.lt.s32.totalorder %v1242_v5, %v1115_v27  ;;  %vm1292_vm7 = vcmp.eq.s32.totalorder %v2477_v42, %v2795_v34 }
 0x24c   : > { %v1410_v23 = vadd.f32 %v1409_v49, %v1352_v35  ;;  %v1246_v40 = vsel %vm1245_vm14, %v1242_v5, %v1115_v27  ;;  %vm1247_vm2 = vcmp.lt.s32.totalorder %v1244_v52, %v1117_v31  ;;  %v1354_v59 = vsel %vm1290_vm11, %v3400_v3, 0.0  ;;  %v3402_v5 = vld [vmem:[#allocation50_spill] sm:$0xff]  ;;  %v2961_v35 = vpop.f32.mrf.mxu1 }
 0x24d   : > { %v1129_v7 = vsel %vm1065_vm10, %v2556_v43, 256  ;;  %v1248_v32 = vsel %vm1247_vm2, %v1244_v52, %v1117_v31  ;;  %vm1249_vm3 = vcmp.lt.s32.totalorder %v1246_v40, %v1119_v54  ;;  %vm1294_vm15 = vcmp.eq.s32.totalorder %v2480_v25, %v2795_v34  ;;  %v3403_v52 = vld [vmem:[#allocation54_spill] sm:$0xff] }
 0x24e   : > { %v1411_v63 = vadd.f32 %v1410_v23, %v1354_v59  ;;  %v1250_v48 = vsel %vm1249_vm3, %v1246_v40, %v1119_v54  ;;  %vm1251_vm9 = vcmp.lt.s32.totalorder %v1248_v32, %v1121_v13  ;;  %v1356_v27 = vsel %vm1292_vm7, %v3401_v55, 0.0  ;;  %v3404_v3 = vld [vmem:[#allocation58_spill] sm:$0xff] }
 0x24f   : > { %v1131_v57 = vsel %vm1067_vm5, %v2559_v45, 256  ;;  %v1252_v49 = vsel %vm1251_vm9, %v1248_v32, %v1121_v13  ;;  %vm1253_vm8 = vcmp.lt.s32.totalorder %v1250_v48, %v1123_v56  ;;  %vm1296_vm10 = vcmp.eq.s32.totalorder %v2483_v44, %v2795_v34  ;;  %v3405_v55 = vld [vmem:[#allocation62_spill] sm:$0xff] }
 0x250   : > { %v1412_v2 = vadd.f32 %v1411_v63, %v1356_v27  ;;  %v1254_v31 = vsel %vm1253_vm8, %v1250_v48, %v1123_v56  ;;  %vm1255_vm0 = vcmp.lt.s32.totalorder %v1252_v49, %v1125_v26  ;;  %v1358_v58 = vsel %vm1294_vm15, %v3402_v5, 0.0 }
 0x251   : > { %v1133_v54 = vsel %vm1069_vm6, %v2568_v39, 256  ;;  %v1256_v59 = vsel %vm1255_vm0, %v1252_v49, %v1125_v26  ;;  %vm1257_vm1 = vcmp.lt.s32.totalorder %v1254_v31, %v1127_v47  ;;  %vm1298_vm5 = vcmp.eq.s32.totalorder %v2486_v33, %v2795_v34  ;;  %v3406_v49 = vld [vmem:[#allocation66_spill] sm:$0xff] }
 0x252   : > { %v1413_v20 = vadd.f32 %v1412_v2, %v1358_v58  ;;  %v1258_v13 = vsel %vm1257_vm1, %v1254_v31, %v1127_v47  ;;  %vm1259_vm12 = vcmp.lt.s32.totalorder %v1256_v59, %v1129_v7  ;;  %v1360_v56 = vsel %vm1296_vm10, %v3403_v52, 0.0  ;;  %v2973_v47 = vpop.f32.mrf.mxu1  ;;  %v3408_v52 = vld [vmem:[#allocation72_spill] sm:$0xff] }
 0x253   : > { %v1135_v23 = vsel %vm1071_vm13, %v2571_v41, 256  ;;  %v1260_v40 = vsel %vm1259_vm12, %v1256_v59, %v1129_v7  ;;  %vm1261_vm11 = vcmp.lt.s32.totalorder %v1258_v13, %v1131_v57  ;;  %vm1300_vm6 = vcmp.eq.s32.totalorder %v2489_v28, %v2795_v34 }
 0x254   : > { %v1414_v15 = vadd.f32 %v1413_v20, %v1360_v56  ;;  %v1262_v26 = vsel %vm1261_vm11, %v1258_v13, %v1131_v57  ;;  %vm1263_vm4 = vcmp.lt.s32.totalorder %v1260_v40, %v1133_v54  ;;  %v1362_v32 = vsel %vm1298_vm5, %v3404_v3, 0.0  ;;  %v2981_v5 = vpop.f32.mrf.mxu1 }
 0x255   : > { %v1264_v63 = vsel %vm1263_vm4, %v1260_v40, %v1133_v54  ;;  %vm1265_vm14 = vcmp.lt.s32.totalorder %v1262_v26, %v1135_v23  ;;  %vm1302_vm7 = vcmp.eq.s32.totalorder %v2496_v30, %v2795_v34  ;;  %v1364_v7 = vsel %vm1300_vm6, %v3405_v55, 0.0  ;;  %v3407_v54 = vld [vmem:[#allocation70_spill] sm:$0xff] }
 0x256   : > { %v1415_v48 = vadd.f32 %v1414_v15, %v1362_v32  ;;  %v1266_v60 = vsel %vm1265_vm14, %v1262_v26, %v1135_v23  ;;  %vm1304_vm2 = vcmp.eq.s32.totalorder %v2499_v21, %v2795_v34  ;;  %v1366_v2 = vsel %vm1302_vm7, %v3406_v49, 0.0  ;;  %v872_v40 = vpop.f32.mrf.mxu1  ;;  %v3409_v26 = vld [vmem:[#allocation78_spill] sm:$0xff] }
 0x257   : > { %vm1267_vm13 = vcmp.lt.s32.totalorder %v1264_v63, %v1266_v60  ;;  %vm1306_vm3 = vcmp.eq.s32.totalorder %v2502_v9, %v2795_v34  ;;  %v1368_v59 = vsel %vm1304_vm2, %v3407_v54, 0.0  ;;  %vm1308_vm9 = vcmp.eq.s32.totalorder %v2505_v53, %v2795_v34 }
 0x258   : > { %v1416_v27 = vadd.f32 %v1415_v48, %v1364_v7  ;;  %v1268_v57 = vsel %vm1267_vm13, %v1264_v63, %v1266_v60  ;;  %v1370_v56 = vsel %vm1306_vm3, %v3408_v52, 0.0  ;;  %vm1310_vm8 = vcmp.eq.s32.totalorder %v2508_v4, %v2795_v34  ;;  %v3410_v63 = vld [vmem:[#allocation83_spill] sm:$0xff]  ;;  %v2993_v60 = vpop.f32.mrf.mxu1 }
 0x259   : > { %v1269_v31 = vrot.slane %v1268_v57, 4  ;;  %v1372_v3 = vsel %vm1308_vm9, %v3409_v26, 0.0  ;;  %v1374_v48 = vsel %vm1310_vm8, %v3410_v63, 0.0  ;;  %vm3411_vm0 = vcmp.eq.s32.totalorder %v2511_v46, %v2795_v34  ;;  %v3413_v52 = vld [vmem:[#allocation11_spill] sm:$0xff]  ;;  %v3414_v26 = vld [vmem:[#allocation12_spill] sm:$0xff]  ;;  %v3415_v63 = vld [vmem:[#allocation73_spill] sm:$0xff] }
 0x25a   : > { %v1417_v58 = vadd.f32 %v1416_v27, %v1366_v2  ;;  %v1376_v7 = vsel %vm3411_vm0, %v2616_v61, 0.0  ;;  %vm1316_vm1 = vcmp.eq.s32.totalorder %v2517_v22, %v2795_v34  ;;  %vm3412_vm5 = vcmp.eq.s32.totalorder %v2514_v19, %v2795_v34  ;;  %v878_v2 = vpop.f32.mrf.mxu1 }
 0x25b   : > { %vm1270_vm15 = vcmp.lt.s32.totalorder %v1268_v57, %v1269_v31  ;;  %v1378_v49 = vsel %vm3412_vm5, %v2668_v10, 0.0  ;;  %vm1318_vm12 = vcmp.eq.s32.totalorder %v2520_v36, %v2795_v34  ;;  %vm1320_vm11 = vcmp.eq.s32.totalorder %v2523_v24, %v2795_v34 }
 0x25c   : > { %v1418_v20 = vadd.f32 %v1417_v58, %v1368_v59  ;;  %v1271_v13 = vsel %vm1270_vm15, %v1268_v57, %v1269_v31  ;;  %v1380_v58 = vsel %vm1316_vm1, %v2720_v8, 0.0  ;;  %v1382_v59 = vsel %vm1318_vm12, %v2762_v38, 0.0 }
 0x25d   : > { %v1272_v23 = vrot.slane %v1271_v13, 2  ;;  %vm1322_vm6 = vcmp.eq.s32.totalorder %v2526_v18, %v2795_v34  ;;  %vm1324_vm14 = vcmp.eq.s32.totalorder %v2539_v6, %v2795_v34  ;;  %vm1326_vm7 = vcmp.eq.s32.totalorder %v2542_v0, %v2795_v34 }
 0x25e   : > { %v1419_v15 = vadd.f32 %v1418_v20, %v1370_v56  ;;  %v3011_v20 = vpop.f32.mrf.mxu1  ;;  %v1386_v56 = vsel %vm1322_vm6, %v3413_v52, 0.0  ;;  %vm1328_vm13 = vcmp.eq.s32.totalorder %v2545_v12, %v2795_v34  ;;  %vm1330_vm15 = vcmp.eq.s32.totalorder %v3346_v16, %v2795_v34  ;;  %v3420_v52 = vld [vmem:[#allocation28_spill] sm:$0xff] }
 0x25f   : > { %vm1273_vm10 = vcmp.lt.s32.totalorder %v1271_v13, %v1272_v23  ;;  %vm1332_vm9 = vcmp.eq.s32.totalorder %v3347_v14, %v2795_v34  ;;  %vm1336_vm1 = vcmp.eq.s32.totalorder %v2559_v45, %v2795_v34  ;;  %vm1338_vm12 = vcmp.eq.s32.totalorder %v2568_v39, %v2795_v34 }
 0x260   : > { %v1420_v32 = vadd.f32 %v1419_v15, %v1372_v3  ;;  %v1274_v57 = vsel %vm1273_vm10, %v1271_v13, %v1272_v23  ;;  %v1384_v13 = vsel %vm1320_vm11, %v2779_v29, 0.0  ;;  %v884_v23 = vpop.f32.mrf.mxu1  ;;  %v1388_v3 = vsel %vm1324_vm14, %v3414_v26, 0.0 }
 0x261   : > { %v1275_v54 = vrot.slane %v1274_v57, 1  ;;  %vm1334_vm10 = vcmp.eq.s32.totalorder %v2556_v43, %v2795_v34  ;;  %vm1340_vm6 = vcmp.eq.s32.totalorder %v2571_v41, %v2795_v34 }
 0x262   : > { %v1421_v55 = vadd.f32 %v1420_v32, %v1374_v48  ;;  %v1390_v32 = vsel %vm1326_vm7, %v2909_v50, 0.0  ;;  %v3416_v48 = vld [vmem:[#allocation75_spill] sm:$0xff] }
 0x263   : > { %vm1276_vm4 = vcmp.lt.s32.totalorder %v1274_v57, %v1275_v54 }
 0x264   : > { %v1422_v27 = vadd.f32 %v1421_v55, %v1376_v7  ;;  %v3021_v15 = vsel %vm1276_vm4, %v1274_v57, %v1275_v54  ;;  %v3031_v55 = vpop.f32.mrf.mxu1  ;;  %v1394_v54 = vsel %vm1330_vm15, %v2973_v47, 0.0  ;;  %v1398_v47 = vsel %vm1334_vm10, %v878_v2, 0.0 }
 0x265   : > { %vm1279_vm2 = vcmp.eq.s32.totalorder %v3415_v63, %v3021_v15  ;;  %vm1281_vm3 = vcmp.eq.s32.totalorder %v3416_v48, %v3021_v15  ;;  %vm1285_vm0 = vcmp.eq.s32.totalorder %v3356_v51, %v3021_v15  ;;  %vm1287_vm5 = vcmp.eq.s32.totalorder %v2468_v62, %v3021_v15  ;;  %v3422_v63 = vld [vmem:[#allocation36_spill] sm:$0xff] }
 0x266   : > { %v1423_v31 = vadd.f32 %v1422_v27, %v1378_v49  ;;  %v1392_v27 = vsel %vm1328_vm13, %v2945_v17, 0.0  ;;  %v3417_v49 = vld [vmem:[#allocation20_spill] sm:$0xff]  ;;  %vm1289_vm11 = vcmp.eq.s32.totalorder %v2471_v37, %v3021_v15  ;;  %v1351_v62 = vsel %vm1287_vm5, %v3422_v63, 0.0 }
 0x267   : > { %v1343_v50 = vsel %vm1279_vm2, %v3417_v49, 0.0  ;;  %vm1291_vm4 = vcmp.eq.s32.totalorder %v2474_v1, %v3021_v15  ;;  %v3423_v49 = vld [vmem:[#allocation40_spill] sm:$0xff]  ;;  %vm1293_vm14 = vcmp.eq.s32.totalorder %v2477_v42, %v3021_v15  ;;  %vm1295_vm7 = vcmp.eq.s32.totalorder %v2480_v25, %v3021_v15 }
 0x268   : > { %v1424_v61 = vadd.f32 %v1423_v31, %v1380_v58  ;;  %v3418_v31 = vld [vmem:[#allocation24_spill] sm:$0xff]  ;;  %vm1297_vm13 = vcmp.eq.s32.totalorder %v2483_v44, %v3021_v15  ;;  %vm1299_vm2 = vcmp.eq.s32.totalorder %v2486_v33, %v3021_v15  ;;  %vm1303_vm15 = vcmp.eq.s32.totalorder %v2496_v30, %v3021_v15 }
 0x269   : > { %v1345_v58 = vsel %vm1281_vm3, %v3418_v31, 0.0  ;;  %vm1301_vm3 = vcmp.eq.s32.totalorder %v2489_v28, %v3021_v15  ;;  %vm1313_vm5 = vcmp.eq.s32.totalorder %v2511_v46, %v3021_v15  ;;  %v3438_v46 = vld [vmem:[#allocation67_spill] sm:$0xff] }
 0x26a   : > { %v1425_v10 = vadd.f32 %v1424_v61, %v1382_v59  ;;  %v3419_v61 = vld [vmem:[#allocation76_spill] sm:$0xff]  ;;  %v890_v59 = vpop.f32.mrf.mxu1  ;;  %v1443_v17 = vadd.f32 %v1345_v58, %v1343_v50  ;;  %v1353_v50 = vsel %vm1289_vm11, %v3423_v49, 0.0  ;;  %v3433_v49 = vld [vmem:[#allocation74_spill] sm:$0xff]  ;;  %vm1317_vm11 = vcmp.eq.s32.totalorder %v2517_v22, %v3021_v15 }
 0x26b   : > { %vm1283_vm8 = vcmp.eq.s32.totalorder %v3419_v61, %v3021_v15  ;;  %v1402_v48 = vsel %vm1338_vm12, %v890_v59, 0.0  ;;  %v3424_v58 = vld [vmem:[#allocation44_spill] sm:$0xff]  ;;  %vm1315_vm12 = vcmp.eq.s32.totalorder %v2514_v19, %v3021_v15  ;;  %v3439_v19 = vld [vmem:[#allocation81_spill] sm:$0xff]  ;;  %v3440_v22 = vld [vmem:[#allocation82_spill] sm:$0xff] }
 0x26c   : > { %v1426_v8 = vadd.f32 %v1425_v10, %v1384_v13  ;;  %v1396_v13 = vsel %vm1332_vm9, %v872_v40, 0.0  ;;  %v3052_v26 = vpop.f32.mrf.mxu1  ;;  %v1355_v34 = vsel %vm1291_vm4, %v3424_v58, 0.0  ;;  %v3425_v59 = vld [vmem:[#allocation48_spill] sm:$0xff]  ;;  %vm1305_vm9 = vcmp.eq.s32.totalorder %v2499_v21, %v3021_v15 }
 0x26d   : > { %v1357_v1 = vsel %vm1293_vm14, %v3425_v59, 0.0  ;;  %vm1321_vm4 = vcmp.eq.s32.totalorder %v2523_v24, %v3021_v15  ;;  %vm1323_vm14 = vcmp.eq.s32.totalorder %v2526_v18, %v3021_v15  ;;  %v3442_v24 = vld [vmem:[#allocation14_spill] sm:$0xff]  ;;  %v3443_v18 = vld [vmem:[#allocation15_spill] sm:$0xff] }
 0x26e   : > { %v1427_v38 = vadd.f32 %v1426_v8, %v1386_v56  ;;  %v1347_v56 = vsel %vm1283_vm8, %v3420_v52, 0.0  ;;  %vm1307_vm8 = vcmp.eq.s32.totalorder %v2502_v9, %v3021_v15 }
 0x26f   : > { %v1371_v21 = vsel %vm1307_vm8, %v3433_v49, 0.0  ;;  %vm1337_vm8 = vcmp.eq.s32.totalorder %v2559_v45, %v3021_v15 }
 0x270   : > { %v1428_v29 = vadd.f32 %v1427_v38, %v1388_v3  ;;  %v1444_v38 = vadd.f32 %v1443_v17, %v1347_v56  ;;  %v3421_v3 = vld [vmem:[#allocation32_spill] sm:$0xff] }
 0x271   : > { %v1349_v51 = vsel %vm1285_vm0, %v3421_v3, 0.0  ;;  %v3426_v17 = vld [vmem:[#allocation52_spill] sm:$0xff]  ;;  %vm1309_vm0 = vcmp.eq.s32.totalorder %v2505_v53, %v3021_v15  ;;  %v3436_v53 = vld [vmem:[#allocation85_spill] sm:$0xff] }
 0x272   : > { %v1429_v7 = vadd.f32 %v1428_v29, %v1390_v32  ;;  %v1400_v29 = vsel %vm1336_vm1, %v884_v23, 0.0  ;;  %v1445_v32 = vadd.f32 %v1444_v38, %v1349_v51  ;;  %v3427_v56 = vld [vmem:[#allocation56_spill] sm:$0xff]  ;;  %vm1311_vm1 = vcmp.eq.s32.totalorder %v2508_v4, %v3021_v15  ;;  %v3437_v4 = vld [vmem:[#allocation86_spill] sm:$0xff] }
 0x273   : > { %v3429_v51 = vld [vmem:[#allocation64_spill] sm:$0xff]  ;;  %v1379_v59 = vsel %vm1315_vm12, %v3437_v4, 0.0  ;;  %vm1497_vm12 = vcmask 1040384  }
 0x274   : > { %v1430_v57 = vadd.f32 %v1429_v7, %v1392_v27  ;;  %v1446_v7 = vadd.f32 %v1445_v32, %v1351_v62  ;;  %v896_v27 = vpop.f32.mrf.mxu1 }
 0x275   : > { %v1404_v23 = vsel %vm1340_vm6, %v896_v27, 0.0  ;;  %vm1319_vm6 = vcmp.eq.s32.totalorder %v2520_v36, %v3021_v15  ;;  %v3441_v36 = vld [vmem:[#allocation13_spill] sm:$0xff] }
 0x276   : > { %v1431_v10 = vadd.f32 %v1430_v57, %v1394_v54  ;;  %v1447_v37 = vadd.f32 %v1446_v7, %v1353_v50  ;;  %v3432_v7 = vld [vmem:[#allocation71_spill] sm:$0xff] }
 0x277   : > { %v1369_v27 = vsel %vm1305_vm9, %v3432_v7, 0.0  ;;  %vm1335_vm9 = vcmp.eq.s32.totalorder %v2556_v43, %v3021_v15 }
 0x278   : > { %v1432_v8 = vadd.f32 %v1431_v10, %v1396_v13  ;;  %v1448_v54 = vadd.f32 %v1447_v37, %v1355_v34 }
 0x27a   : > { %v1433_v40 = vadd.f32 %v1432_v8, %v1398_v47  ;;  %v1449_v10 = vadd.f32 %v1448_v54, %v1357_v1  ;;  %v1359_v8 = vsel %vm1295_vm7, %v3426_v17, 0.0  ;;  %v1361_v47 = vsel %vm1297_vm13, %v3427_v56, 0.0 }
 0x27b   : > { %v1377_v54 = vsel %vm1313_vm5, %v3436_v53, 0.0  ;;  %v1383_v17 = vsel %vm1319_vm6, %v3439_v19, 0.0  ;;  %vm1325_vm7 = vcmp.eq.s32.totalorder %v2539_v6, %v3021_v15  ;;  %v1387_v56 = vsel %vm1323_vm14, %v3441_v36, 0.0 }
 0x27c   : > { %v1434_v2 = vadd.f32 %v1433_v40, %v1400_v29  ;;  %v1450_v42 = vadd.f32 %v1449_v10, %v1359_v8  ;;  %v3428_v40 = vld [vmem:[#allocation60_spill] sm:$0xff]  ;;  %v1365_v29 = vsel %vm1301_vm3, %v3429_v51, 0.0  ;;  %v1381_v10 = vsel %vm1317_vm11, %v3438_v46, 0.0 }
 0x27d   : > { %v1363_v3 = vsel %vm1299_vm2, %v3428_v40, 0.0  ;;  %vm1327_vm13 = vcmp.eq.s32.totalorder %v2542_v0, %v3021_v15  ;;  %vm1329_vm2 = vcmp.eq.s32.totalorder %v2545_v12, %v3021_v15  ;;  %vm1331_vm3 = vcmp.eq.s32.totalorder %v3346_v16, %v3021_v15 }
 0x27e   : > { %v1435_v57 = vadd.f32 %v1434_v2, %v1402_v48  ;;  %v1451_v25 = vadd.f32 %v1450_v42, %v1361_v47  ;;  %v3430_v2 = vld [vmem:[#allocation68_spill] sm:$0xff]  ;;  %v3431_v48 = vld [vmem:[#allocation79_spill] sm:$0xff]  ;;  %v1385_v42 = vsel %vm1321_vm4, %v3440_v22, 0.0  ;;  %v1391_v40 = vsel %vm1327_vm13, %v3443_v18, 0.0 }
 0x27f   : > { %v1367_v63 = vsel %vm1303_vm15, %v3430_v2, 0.0  ;;  %vm1480_vm10 = vcmp.lt.f32.partialorder %v3431_v48, inf  ;;  %v1393_v6 = vsel %vm1329_vm2, %v2961_v35, 0.0  ;;  %vm1333_vm15 = vcmp.eq.s32.totalorder %v3347_v14, %v3021_v15 }
 0x280   : > { %v1436_v31 = vadd.f32 %v1435_v57, %v1404_v23  ;;  %v1452_v44 = vadd.f32 %v1451_v25, %v1363_v3  ;;  %v3434_v23 = vld [vmem:[#allocation80_spill] sm:$0xff]  ;;  %v1389_v25 = vsel %vm1325_vm7, %v3442_v24, 0.0  ;;  %v1395_v0 = vsel %vm1331_vm3, %v2981_v5, 0.0 }
 0x281   : > { %v1373_v37 = vsel %vm1309_vm0, %v3434_v23, 0.0  ;;  %v1397_v12 = vsel %vm1333_vm15, %v2993_v60, 0.0  ;;  %v1399_v16 = vsel %vm1335_vm9, %v3011_v20, 0.0  ;;  %v1401_v14 = vsel %vm1337_vm8, %v3031_v55, 0.0 }
 0x282   : > { %v1437_v61 = vrot.slane %v1436_v31, 4  ;;  %v1453_v33 = vadd.f32 %v1452_v44, %v1365_v29  ;;  %vm1341_vm0 = vcmp.eq.s32.totalorder %v2571_v41, %v3021_v15  ;;  %v3444_v20 = vlaneseq }
 0x284   : > { %v1438_v13 = vadd.f32 %v1437_v61, %v1436_v31  ;;  %v1454_v28 = vadd.f32 %v1453_v33, %v1367_v63  ;;  %v3435_v31 = vld [vmem:[#allocation84_spill] sm:$0xff] }
 0x285   : > { %v1375_v58 = vsel %vm1311_vm1, %v3435_v31, 0.0  ;;  %vm1481_vm1 = vcmp.lt.f32.partialorder %v2727_v11, inf }
 0x286   : > { %v1439_v52 = vrot.slane %v1438_v13, 2  ;;  %v1455_v57 = vadd.f32 %v1454_v28, %v1369_v27  ;;  %v1487_v28 = vand.u32 127, %v3444_v20 }
 0x288   : > { %v1440_v38 = vadd.f32 %v1439_v52, %v1438_v13  ;;  %v1456_v50 = vadd.f32 %v1455_v57, %v1371_v21  ;;  %v1488_v7 = vadd.s32 128, %v1487_v28 }
 0x28a   : > { %v1441_v32 = vrot.slane %v1440_v38, 1  ;;  %v1457_v9 = vadd.f32 %v1456_v50, %v1373_v37  ;;  %vm1494_vm5 = vcmp.lt.s32.totalorder %v1488_v7, 200 }
 0x28c   : > { %v1442_v62 = vadd.f32 %v1441_v32, %v1440_v38  ;;  %v1458_v34 = vadd.f32 %v1457_v9, %v1375_v58  ;;  %v898_v32 = vpop.f32.mrf.mxu1 }
 0x28d   : > { %v1405_v33 = vsel %vm1341_vm0, %v898_v32, 0.0 }
 0x28e   : > { %v3090_v30 = vsel %vm1480_vm10, %v1442_v62, 0.0  ;;  %v1459_v61 = vadd.f32 %v1458_v34, %v1377_v54  ;;  %vm1339_vm10 = vcmp.eq.s32.totalorder %v2568_v39, %v3021_v15 }
 0x28f   : > { %v1403_v43 = vsel %vm1339_vm10, %v3052_v26, 0.0  ;;  %v1484_v41 = vand.u32 2147483647, %v3090_v30 }
 0x290   : > { %v1460_v1 = vadd.f32 %v1459_v61, %v1379_v59 }
 0x291   : > { %v1498_v57 = vsel %vm1497_vm12, %v1484_v41, 0.0 }
 0x292   : > { %v1461_v13 = vadd.f32 %v1460_v1, %v1381_v10 }
 0x294   : > { %v1462_v8 = vadd.f32 %v1461_v13, %v1383_v17 }
 0x296   : > { %v1463_v52 = vadd.f32 %v1462_v8, %v1385_v42 }
 0x298   : > { %v1464_v47 = vadd.f32 %v1463_v52, %v1387_v56 }
 0x29a   : > { %v1465_v38 = vadd.f32 %v1464_v47, %v1389_v25 }
 0x29c   : > { %v1466_v3 = vadd.f32 %v1465_v38, %v1391_v40 }
 0x29e   : > { %v1467_v44 = vadd.f32 %v1466_v3, %v1393_v6 }
 0x2a0   : > { %v1468_v51 = vadd.f32 %v1467_v44, %v1395_v0 }
 0x2a2   : > { %v1469_v29 = vadd.f32 %v1468_v51, %v1397_v12 }
 0x2a4   : > { %v1470_v35 = vadd.f32 %v1469_v29, %v1399_v16 }
 0x2a6   : > { %v1471_v5 = vadd.f32 %v1470_v35, %v1401_v14 }
 0x2a8   : > { %v1472_v60 = vadd.f32 %v1471_v5, %v1403_v43 }
 0x2aa   : > { %v1473_v2 = vadd.f32 %v1472_v60, %v1405_v33 }
 0x2ac   : > { %v1474_v45 = vrot.slane %v1473_v2, 4 }
 0x2ae   : > { %v1475_v63 = vadd.f32 %v1474_v45, %v1473_v2 }
 0x2b0   : > { %v1476_v62 = vrot.slane %v1475_v63, 2 }
 0x2b2   : > { %v1477_v48 = vadd.f32 %v1476_v62, %v1475_v63 }
 0x2b4   : > { %v1478_v39 = vrot.slane %v1477_v48, 1 }
 0x2b6   : > { %v1479_v27 = vadd.f32 %v1478_v39, %v1477_v48 }
 0x2b8   : > { %v1483_v55 = vsel %vm1481_vm1, %v1479_v27, 0.0 }
 0x2b9   : > { %v1485_v15 = vand.u32 2147483647, %v1483_v55 }
 0x2bb   : > { %v1496_v26 = vsel %vm1494_vm5, %v1485_v15, 0.0 }
 0x2bc   : > { %v1499_v49 = vsel %vm1497_vm12, %v1496_v26, 0.0 }
 0x2bd   : > { %v1500_v21 = vadd.f32 %v1499_v49, %v1498_v57 }
 0x2bf   : > { %1501 = vadd.xlane.f32.xlu1 %v1500_v21 }
 0x348   : > { %v1502_v50 = vpop.xlane.xlu1 %1501 }
 0x349   : > { %v1503_v23 = vrot.slane %v1502_v50, 4 }
 0x34b   : > { %v1504_v37 = vadd.f32 %v1503_v23, %v1502_v50 }
 0x34d   : > { %v1505_v9 = vrot.slane %v1504_v37, 2 }
 0x34f   : > { %v1506_v31 = vadd.f32 %v1505_v9, %v1504_v37 }
 0x351   : > { %v1507_v11 = vrot.slane %v1506_v31, 1 }
 0x353   : > { %v1508_v58 = vadd.f32 %v1507_v11, %v1506_v31 }
 0x355   : > { %1718 = vpush %v1508_v58 }
 0x386   : > { %s1719_s7 = spop %1718 }
 0x387   : > { %v1510_v30 = vstv %s1719_s7 }
 0x388   : > { %1511 = vst [vmem:[%s217_s28] sm:$0xff] %v1510_v30 }
 0x389   : > { %1859 = shalt.err (!%p1856_p7)
}
 0x38a   : > { %s1860_s19 = scalar_lea.hbm %s1525_s16, 128  ;;  %s1864_s5 = scalar_lea.hbm %s3195_s2, 256 }
 0x38b   : > { %p1861_p1 = scmp.ne.s32.totalorder %s1525_s16, %s1860_s19  ;;  %p1865_p3 = scmp.lt.s32.totalorder %s1525_s16, %s3195_s2 }
 0x38c   : > { %p1866_p8 = scmp.lt.s32.totalorder %s1864_s5, %s1860_s19 }
 0x38d   : > { %p1862_p10 = pnand %p1861_p1, %p2004_p9 }
 0x38e   : > { %p1867_p0 = por %p1866_p8, %p1865_p3 }
 0x38f   : > { %p1863_p13 = pneg %p1862_p10 }
 0x391   : > { %p1868_p12 = pnand %p1867_p0, %p1863_p13 }
 0x393   : > { %1871 = shalt.err (!%p1868_p12)
}
 0x394   : > { %1724 = dma.vmem_to_hbm [thread:$0]  (%p2004_p9), %s3148_s29, 128, %s1525_s16, %s1513_s30  }
 0x395 PF: > { %s1539_s21 = sand.u32 1, %s1910_s9   ;;  %p3445_p2 = scmp.ge.s32.totalorder %s1930_s14, 2 }
 0x396   : > { %s1540_s28 = scalar_lea.sflag [#allocation4], %s1539_s21 }
 0x397   : > { %p1734_p5 = pnand %p3445_p2, %p2011_p11 }
 0x399   : > { %p1735_p6 = pneg %p1734_p5 }
 0x39b   : > { %1905 = dma.done.wait (%p1735_p6), %s1540_s28, 128  }
 0x39c   : > { %1907 = vsyncadd (%p1735_p6), %s1540_s28, 4294967168  ;;  %s21_s14 = sadd.s32 1, %s1930_s14   ;;  %s3446_s9 = smov %s1914_s10 }
 0x39d   : > { %p18_p4 = scmp.ge.s32.totalorder %s21_s14, 4   ;;  %s3447_s10 = smov %s1918_s11 }
 0x39e   : > { %s3448_s11 = smov %s2009_s23  ;;  %s3449_s12 = smov %s1926_s13 }
 0x39f   : > { %s3450_s13 = smov %s3452_s17  ;;  %20 = sbr.rel (!%p18_p4) target bundleno = 8 (0x8), region = 87 }
 0x3a4   :  { %1545 = vsyncpa [#allocation3], 1 }
 0x3a5   :  { %1547 = vsyncpa [#allocation3 + $0x1], 1 }
 0x3a6   :  { %1548 = vsyncpa [#allocation6], 1 }
 0x3a7   :  { %1550 = vsyncpa [#allocation6 + $0x1], 1 }
 0x3a8   :  { %1551 = vsyncpa [#allocation4], 1 }
 0x3a9   :  { %1553 = vsyncpa [#allocation4 + $0x1], 1 }

</bundles_post_ra>
